<compile_context>
chip_gen: v7x
topology: tpu7x:2x2x1
jax: 0.10.0
libtpu: 0.0.40
codegen_flags: <defaults>
</compile_context>

<pallas_src>
import functools

import jax
import jax.numpy as jnp
from jax.experimental import pallas as pl
from jax.experimental.pallas import tpu as pltpu


def _round_up(x, m):
    return ((x + m - 1) // m) * m


# ------------------------------- fused kernel ------------------------------- #

def _mlp_fused_kernel(x_ref, v_ref, g_ref, b_ref, wf_ref, bf_ref, o_ref,
                      h_ref, s_ref, *, nr_layers, skip_connections,
                      compute_dtype):
    """Whole MLP for one batch tile.

    x_ref : [TM, F]        zero-padded input tile
    v_ref : [L, F, F]      stacked un-normalized hidden weights (zero-padded)
    g_ref : [L, 1, F]      weight-norm gains
    b_ref : [L, 1, F]      hidden biases
    wf_ref: [F, Fo]        final-layer weight (no weight norm)
    bf_ref: [1, Fo]        final-layer bias
    o_ref : [TM, Fo]       sigmoid output tile
    h_ref, s_ref : VMEM scratch [TM, F] (activation / skip buffer)
    """
    h_ref[...] = x_ref[...]
    have_skip = False

    for l in range(nr_layers):                      # statically unrolled
        v = v_ref[l]                                # [F, F]
        # ||v||^2 per output column; clamp so zero-padded columns give w == 0
        # (not NaN) instead of 0 * inf.
        nsq = jnp.maximum(jnp.sum(v * v, axis=0, keepdims=True), 1e-30)
        w = v * (g_ref[l] * jax.lax.rsqrt(nsq))     # [F, F]
        y = jnp.dot(h_ref[...].astype(compute_dtype), w.astype(compute_dtype),
                    preferred_element_type=jnp.float32) + b_ref[l]
        h_ref[...] = y * (1.0 / (1.0 + jnp.exp(-y)))   # SiLU

        if skip_connections and (l % 2 == 0):
            if have_skip:
                cur = h_ref[...]
                h_ref[...] = cur + s_ref[...]
                s_ref[...] = cur
            else:
                s_ref[...] = h_ref[...]
                have_skip = True

    y = jnp.dot(h_ref[...].astype(compute_dtype), wf_ref[...].astype(compute_dtype),
                preferred_element_type=jnp.float32) + bf_ref[...]
    o_ref[...] = 1.0 / (1.0 + jnp.exp(-y))          # Sigmoid


# ------------------------------ pallas_call glue ----------------------------- #

def fully_connected_arch_core(packed, x, out_features, *, skip_connections=False,
                              tm=256, compute_dtype=jnp.float32):
    """Fused Pallas forward matching FullyConnectedArchCore.forward."""
    n, fin = x.shape
    L, F, _ = packed["V"].shape
    Fo = packed["Wf"].shape[1]

    TM = min(tm, _round_up(n, 8))                   # batch tile (sublane-aligned)
    n_pad = _round_up(n, TM)

    xp = jnp.zeros((n_pad, F), jnp.float32).at[:n, :fin].set(x)

    kernel = functools.partial(_mlp_fused_kernel, nr_layers=L,
                               skip_connections=skip_connections,
                               compute_dtype=compute_dtype)

    out = pl.pallas_call(
        kernel,
        out_shape=jax.ShapeDtypeStruct((n_pad, Fo), jnp.float32),
        grid=(n_pad // TM,),
        in_specs=[
            pl.BlockSpec((TM, F), lambda i: (i, 0)),        # x tile
            pl.BlockSpec((L, F, F), lambda i: (0, 0, 0)),   # stacked V
            pl.BlockSpec((L, 1, F), lambda i: (0, 0, 0)),   # stacked g
            pl.BlockSpec((L, 1, F), lambda i: (0, 0, 0)),   # stacked b
            pl.BlockSpec((F, Fo), lambda i: (0, 0)),        # final W
            pl.BlockSpec((1, Fo), lambda i: (0, 0)),        # final b
        ],
        out_specs=pl.BlockSpec((TM, Fo), lambda i: (i, 0)),
        scratch_shapes=[pltpu.VMEM((TM, F), jnp.float32),   # activation
                        pltpu.VMEM((TM, F), jnp.float32)],  # skip buffer
        compiler_params=pltpu.CompilerParams(
            dimension_semantics=("parallel",)),
    )(xp, packed["V"], packed["G"], packed["B"], packed["Wf"], packed["bf"])

    return out[:n, :out_features]


# ------------------------------ params handling ------------------------------ #

def init_params(key, in_features, layer_size, out_features, nr_layers):
    """Raw per-layer params (PyTorch-equivalent, stored as [in, out])."""
    hidden = []
    fin = in_features
    for _ in range(nr_layers):
        key, k1, k2 = jax.random.split(key, 3)
        v = jax.random.normal(k1, (fin, layer_size), jnp.float32) / jnp.sqrt(float(fin))
        g = jnp.ones((1, layer_size), jnp.float32)
        b = 0.01 * jax.random.normal(k2, (1, layer_size), jnp.float32)
        hidden.append((v, g, b))
        fin = layer_size
    key, k1, k2 = jax.random.split(key, 3)
    w = jax.random.normal(k1, (layer_size, out_features), jnp.float32) / jnp.sqrt(float(layer_size))
    b = 0.01 * jax.random.normal(k2, (1, out_features), jnp.float32)
    return {"hidden": hidden, "final": (w, b)}


def pack_params(params, in_features, layer_size, out_features):
    """Zero-pad feature dims to multiples of 128 and stack hidden layers."""
    F = _round_up(max(in_features, layer_size), 128)
    Fo = _round_up(out_features, 128)
    L = len(params["hidden"])

    V = jnp.zeros((L, F, F), jnp.float32)
    G = jnp.zeros((L, 1, F), jnp.float32)
    B = jnp.zeros((L, 1, F), jnp.float32)
    for l, (v, g, b) in enumerate(params["hidden"]):
        fin, fout = v.shape
        V = V.at[l, :fin, :fout].set(v)
        G = G.at[l, :, :fout].set(g)
        B = B.at[l, :, :fout].set(b)

    w, b = params["final"]
    Wf = jnp.zeros((F, Fo), jnp.float32).at[:w.shape[0], :w.shape[1]].set(w)
    bf = jnp.zeros((1, Fo), jnp.float32).at[:, :b.shape[1]].set(b)
    return {"V": V, "G": G, "B": B, "Wf": Wf, "bf": bf}


# -------------------------------- reference ---------------------------------- #

def _reference(params, x, skip_connections=False):
    """Plain-JAX reference (unpadded) for correctness checking."""
    x_skip = None
    for i, (v, g, b) in enumerate(params["hidden"]):
        norm = jnp.sqrt(jnp.sum(v * v, axis=0, keepdims=True))
        y = x @ (v * (g / norm)) + b
        x = y * (1.0 / (1.0 + jnp.exp(-y)))
        if skip_connections and i % 2 == 0:
            if x_skip is not None:
                x, x_skip = x + x_skip, x
            else:
                x_skip = x
    w, b = params["final"]
    y = x @ w + b
    return 1.0 / (1.0 + jnp.exp(-y))


# ----------------------------------- main ------------------------------------ #

if __name__ == "__main__":
    # Small shapes consistent with the module (default nr_layers=6).
    batch, in_features, layer_size, out_features, nr_layers = 8, 32, 64, 16, 6

    key = jax.random.PRNGKey(0)
    key, kx, kp = jax.random.split(key, 3)
    x = jax.random.normal(kx, (batch, in_features), jnp.float32)
    params = init_params(kp, in_features, layer_size, out_features, nr_layers)
    packed = pack_params(params, in_features, layer_size, out_features)

    # default path (skip_connections=False)
    out = fully_connected_arch_core(packed, x, out_features)
    out = jax.block_until_ready(out)
    ref = _reference(params, x)
    assert out.shape == (batch, out_features)
    assert jnp.allclose(out, ref, atol=1e-5, rtol=1e-5), "mismatch vs reference"

    # skip_connections=True path (supported by the module, checked too)
    out_s = fully_connected_arch_core(packed, x, out_features, skip_connections=True)
    out_s = jax.block_until_ready(out_s)
    ref_s = _reference(params, x, skip_connections=True)
    assert jnp.allclose(out_s, ref_s, atol=1e-5, rtol=1e-5), "mismatch (skip) vs reference"

    print("KERNEL_OK")
</pallas_src>

<mosaic_0001>
module attributes {stable_mosaic.version = 11 : i64} {
  func.func @_mlp_fused_kernel(%arg0: i32, %arg1: memref<8x128xf32, #tpu.memory_space<vmem>>, %arg2: memref<6x128x128xf32, #tpu.memory_space<vmem>>, %arg3: memref<6x1x128xf32, #tpu.memory_space<vmem>>, %arg4: memref<6x1x128xf32, #tpu.memory_space<vmem>>, %arg5: memref<128x128xf32, #tpu.memory_space<vmem>>, %arg6: memref<1x128xf32, #tpu.memory_space<vmem>>, %arg7: memref<8x128xf32, #tpu.memory_space<vmem>>, %arg8: memref<8x128xf32, #tpu.memory_space<vmem>>, %arg9: memref<8x128xf32, #tpu.memory_space<vmem>>) attributes {dimension_semantics = [#tpu.dimension_semantics<parallel>], iteration_bounds = array<i64: 1>, scalar_prefetch = 0 : i64, scratch_operands = 2 : i64, tpu.core_type = #tpu.core_type<tc>, window_params = [{transform_indices = @transform_0, window_bounds = array<i64: 8, 128>}, {pipeline_mode = #tpu.pipeline_mode<synchronous>, transform_indices = @transform_1, window_bounds = array<i64: 6, 128, 128>}, {pipeline_mode = #tpu.pipeline_mode<synchronous>, transform_indices = @transform_2, window_bounds = array<i64: 6, 1, 128>}, {pipeline_mode = #tpu.pipeline_mode<synchronous>, transform_indices = @transform_3, window_bounds = array<i64: 6, 1, 128>}, {pipeline_mode = #tpu.pipeline_mode<synchronous>, transform_indices = @transform_4, window_bounds = array<i64: 128, 128>}, {pipeline_mode = #tpu.pipeline_mode<synchronous>, transform_indices = @transform_5, window_bounds = array<i64: 1, 128>}, {transform_indices = @transform_6, window_bounds = array<i64: 8, 128>}]} {
    %c0 = arith.constant 0 : index
    %c0_0 = arith.constant 0 : index
    %0 = vector.load %arg1[%c0, %c0_0] : memref<8x128xf32, #tpu.memory_space<vmem>>, vector<8x128xf32>
    %c0_1 = arith.constant 0 : index
    %c0_2 = arith.constant 0 : index
    %1 = vector.load %arg8[%c0_1, %c0_2] : memref<8x128xf32, #tpu.memory_space<vmem>>, vector<8x128xf32>
    tpu.vector_store %arg8[%c0_1, %c0_2], %0 {strides = array<i32>} : memref<8x128xf32, #tpu.memory_space<vmem>>, vector<8x128xf32>,
    %c0_3 = arith.constant 0 : index
    %c0_4 = arith.constant 0 : index
    %c0_5 = arith.constant 0 : index
    %2 = vector.load %arg2[%c0_3, %c0_4, %c0_5] : memref<6x128x128xf32, #tpu.memory_space<vmem>>, vector<1x128x128xf32>
    %3 = vector.shape_cast %2 : vector<1x128x128xf32> to vector<128x128xf32>
    %4 = arith.mulf %3, %3 : vector<128x128xf32>
    %cst = arith.constant dense<0.000000e+00> : vector<128xf32>
    %5 = vector.multi_reduction <add>, %4, %cst [0] : vector<128x128xf32> to vector<128xf32>
    %6 = vector.shape_cast %5 : vector<128xf32> to vector<1x128xf32>
    %cst_6 = arith.constant 1.000000e-30 : f32
    %7 = vector.broadcast %cst_6 : f32 to vector<1x128xf32>
    %8 = arith.maximumf %6, %7 : vector<1x128xf32>
    %c0_7 = arith.constant 0 : index
    %c0_8 = arith.constant 0 : index
    %c0_9 = arith.constant 0 : index
    %9 = vector.load %arg3[%c0_7, %c0_8, %c0_9] : memref<6x1x128xf32, #tpu.memory_space<vmem>>, vector<1x1x128xf32>
    %10 = vector.shape_cast %9 : vector<1x1x128xf32> to vector<1x128xf32>
    %11 = math.rsqrt %8 : vector<1x128xf32>
    %12 = arith.mulf %10, %11 : vector<1x128xf32>
    %13 = vector.broadcast %12 : vector<1x128xf32> to vector<128x128xf32>
    %14 = arith.mulf %3, %13 : vector<128x128xf32>
    %c0_10 = arith.constant 0 : index
    %c0_11 = arith.constant 0 : index
    %15 = vector.load %arg8[%c0_10, %c0_11] : memref<8x128xf32, #tpu.memory_space<vmem>>, vector<8x128xf32>
    %cst_12 = arith.constant dense<0.000000e+00> : vector<8x128xf32>
    %16 = tpu.matmul %15, %14, %cst_12 {dimension_numbers = #tpu.dot_dimension_numbers<[1], [0], [0], [1], [0, 0, 1, 1], [], []>} : vector<8x128xf32>, vector<128x128xf32>, vector<8x128xf32> -> vector<8x128xf32>
    %c0_13 = arith.constant 0 : index
    %c0_14 = arith.constant 0 : index
    %c0_15 = arith.constant 0 : index
    %17 = vector.load %arg4[%c0_13, %c0_14, %c0_15] : memref<6x1x128xf32, #tpu.memory_space<vmem>>, vector<1x1x128xf32>
    %18 = vector.shape_cast %17 : vector<1x1x128xf32> to vector<1x128xf32>
    %19 = vector.broadcast %18 : vector<1x128xf32> to vector<8x128xf32>
    %20 = arith.addf %16, %19 : vector<8x128xf32>
    %cst_16 = arith.constant 0.000000e+00 : f32
    %21 = vector.broadcast %cst_16 : f32 to vector<8x128xf32>
    %22 = arith.subf %21, %20 : vector<8x128xf32>
    %23 = math.exp %22 : vector<8x128xf32>
    %cst_17 = arith.constant 1.000000e+00 : f32
    %24 = vector.broadcast %cst_17 : f32 to vector<8x128xf32>
    %25 = arith.addf %24, %23 : vector<8x128xf32>
    %cst_18 = arith.constant 1.000000e+00 : f32
    %26 = vector.broadcast %cst_18 : f32 to vector<8x128xf32>
    %27 = arith.divf %26, %25 : vector<8x128xf32>
    %28 = arith.mulf %20, %27 : vector<8x128xf32>
    %c0_19 = arith.constant 0 : index
    %c0_20 = arith.constant 0 : index
    %29 = vector.load %arg8[%c0_19, %c0_20] : memref<8x128xf32, #tpu.memory_space<vmem>>, vector<8x128xf32>
    tpu.vector_store %arg8[%c0_19, %c0_20], %28 {strides = array<i32>} : memref<8x128xf32, #tpu.memory_space<vmem>>, vector<8x128xf32>,
    %c1 = arith.constant 1 : index
    %c0_21 = arith.constant 0 : index
    %c0_22 = arith.constant 0 : index
    %30 = vector.load %arg2[%c1, %c0_21, %c0_22] : memref<6x128x128xf32, #tpu.memory_space<vmem>>, vector<1x128x128xf32>
    %31 = vector.shape_cast %30 : vector<1x128x128xf32> to vector<128x128xf32>
    %32 = arith.mulf %31, %31 : vector<128x128xf32>
    %cst_23 = arith.constant dense<0.000000e+00> : vector<128xf32>
    %33 = vector.multi_reduction <add>, %32, %cst_23 [0] : vector<128x128xf32> to vector<128xf32>
    %34 = vector.shape_cast %33 : vector<128xf32> to vector<1x128xf32>
    %cst_24 = arith.constant 1.000000e-30 : f32
    %35 = vector.broadcast %cst_24 : f32 to vector<1x128xf32>
    %36 = arith.maximumf %34, %35 : vector<1x128xf32>
    %c1_25 = arith.constant 1 : index
    %c0_26 = arith.constant 0 : index
    %c0_27 = arith.constant 0 : index
    %37 = vector.load %arg3[%c1_25, %c0_26, %c0_27] : memref<6x1x128xf32, #tpu.memory_space<vmem>>, vector<1x1x128xf32>
    %38 = vector.shape_cast %37 : vector<1x1x128xf32> to vector<1x128xf32>
    %39 = math.rsqrt %36 : vector<1x128xf32>
    %40 = arith.mulf %38, %39 : vector<1x128xf32>
    %41 = vector.broadcast %40 : vector<1x128xf32> to vector<128x128xf32>
    %42 = arith.mulf %31, %41 : vector<128x128xf32>
    %c0_28 = arith.constant 0 : index
    %c0_29 = arith.constant 0 : index
    %43 = vector.load %arg8[%c0_28, %c0_29] : memref<8x128xf32, #tpu.memory_space<vmem>>, vector<8x128xf32>
    %cst_30 = arith.constant dense<0.000000e+00> : vector<8x128xf32>
    %44 = tpu.matmul %43, %42, %cst_30 {dimension_numbers = #tpu.dot_dimension_numbers<[1], [0], [0], [1], [0, 0, 1, 1], [], []>} : vector<8x128xf32>, vector<128x128xf32>, vector<8x128xf32> -> vector<8x128xf32>
    %c1_31 = arith.constant 1 : index
    %c0_32 = arith.constant 0 : index
    %c0_33 = arith.constant 0 : index
    %45 = vector.load %arg4[%c1_31, %c0_32, %c0_33] : memref<6x1x128xf32, #tpu.memory_space<vmem>>, vector<1x1x128xf32>
    %46 = vector.shape_cast %45 : vector<1x1x128xf32> to vector<1x128xf32>
    %47 = vector.broadcast %46 : vector<1x128xf32> to vector<8x128xf32>
    %48 = arith.addf %44, %47 : vector<8x128xf32>
    %cst_34 = arith.constant 0.000000e+00 : f32
    %49 = vector.broadcast %cst_34 : f32 to vector<8x128xf32>
    %50 = arith.subf %49, %48 : vector<8x128xf32>
    %51 = math.exp %50 : vector<8x128xf32>
    %cst_35 = arith.constant 1.000000e+00 : f32
    %52 = vector.broadcast %cst_35 : f32 to vector<8x128xf32>
    %53 = arith.addf %52, %51 : vector<8x128xf32>
    %cst_36 = arith.constant 1.000000e+00 : f32
    %54 = vector.broadcast %cst_36 : f32 to vector<8x128xf32>
    %55 = arith.divf %54, %53 : vector<8x128xf32>
    %56 = arith.mulf %48, %55 : vector<8x128xf32>
    %c0_37 = arith.constant 0 : index
    %c0_38 = arith.constant 0 : index
    %57 = vector.load %arg8[%c0_37, %c0_38] : memref<8x128xf32, #tpu.memory_space<vmem>>, vector<8x128xf32>
    tpu.vector_store %arg8[%c0_37, %c0_38], %56 {strides = array<i32>} : memref<8x128xf32, #tpu.memory_space<vmem>>, vector<8x128xf32>,
    %c2 = arith.constant 2 : index
    %c0_39 = arith.constant 0 : index
    %c0_40 = arith.constant 0 : index
    %58 = vector.load %arg2[%c2, %c0_39, %c0_40] : memref<6x128x128xf32, #tpu.memory_space<vmem>>, vector<1x128x128xf32>
    %59 = vector.shape_cast %58 : vector<1x128x128xf32> to vector<128x128xf32>
    %60 = arith.mulf %59, %59 : vector<128x128xf32>
    %cst_41 = arith.constant dense<0.000000e+00> : vector<128xf32>
    %61 = vector.multi_reduction <add>, %60, %cst_41 [0] : vector<128x128xf32> to vector<128xf32>
    %62 = vector.shape_cast %61 : vector<128xf32> to vector<1x128xf32>
    %cst_42 = arith.constant 1.000000e-30 : f32
    %63 = vector.broadcast %cst_42 : f32 to vector<1x128xf32>
    %64 = arith.maximumf %62, %63 : vector<1x128xf32>
    %c2_43 = arith.constant 2 : index
    %c0_44 = arith.constant 0 : index
    %c0_45 = arith.constant 0 : index
    %65 = vector.load %arg3[%c2_43, %c0_44, %c0_45] : memref<6x1x128xf32, #tpu.memory_space<vmem>>, vector<1x1x128xf32>
    %66 = vector.shape_cast %65 : vector<1x1x128xf32> to vector<1x128xf32>
    %67 = math.rsqrt %64 : vector<1x128xf32>
    %68 = arith.mulf %66, %67 : vector<1x128xf32>
    %69 = vector.broadcast %68 : vector<1x128xf32> to vector<128x128xf32>
    %70 = arith.mulf %59, %69 : vector<128x128xf32>
    %c0_46 = arith.constant 0 : index
    %c0_47 = arith.constant 0 : index
    %71 = vector.load %arg8[%c0_46, %c0_47] : memref<8x128xf32, #tpu.memory_space<vmem>>, vector<8x128xf32>
    %cst_48 = arith.constant dense<0.000000e+00> : vector<8x128xf32>
    %72 = tpu.matmul %71, %70, %cst_48 {dimension_numbers = #tpu.dot_dimension_numbers<[1], [0], [0], [1], [0, 0, 1, 1], [], []>} : vector<8x128xf32>, vector<128x128xf32>, vector<8x128xf32> -> vector<8x128xf32>
    %c2_49 = arith.constant 2 : index
    %c0_50 = arith.constant 0 : index
    %c0_51 = arith.constant 0 : index
    %73 = vector.load %arg4[%c2_49, %c0_50, %c0_51] : memref<6x1x128xf32, #tpu.memory_space<vmem>>, vector<1x1x128xf32>
    %74 = vector.shape_cast %73 : vector<1x1x128xf32> to vector<1x128xf32>
    %75 = vector.broadcast %74 : vector<1x128xf32> to vector<8x128xf32>
    %76 = arith.addf %72, %75 : vector<8x128xf32>
    %cst_52 = arith.constant 0.000000e+00 : f32
    %77 = vector.broadcast %cst_52 : f32 to vector<8x128xf32>
    %78 = arith.subf %77, %76 : vector<8x128xf32>
    %79 = math.exp %78 : vector<8x128xf32>
    %cst_53 = arith.constant 1.000000e+00 : f32
    %80 = vector.broadcast %cst_53 : f32 to vector<8x128xf32>
    %81 = arith.addf %80, %79 : vector<8x128xf32>
    %cst_54 = arith.constant 1.000000e+00 : f32
    %82 = vector.broadcast %cst_54 : f32 to vector<8x128xf32>
    %83 = arith.divf %82, %81 : vector<8x128xf32>
    %84 = arith.mulf %76, %83 : vector<8x128xf32>
    %c0_55 = arith.constant 0 : index
    %c0_56 = arith.constant 0 : index
    %85 = vector.load %arg8[%c0_55, %c0_56] : memref<8x128xf32, #tpu.memory_space<vmem>>, vector<8x128xf32>
    tpu.vector_store %arg8[%c0_55, %c0_56], %84 {strides = array<i32>} : memref<8x128xf32, #tpu.memory_space<vmem>>, vector<8x128xf32>,
    %c3 = arith.constant 3 : index
    %c0_57 = arith.constant 0 : index
    %c0_58 = arith.constant 0 : index
    %86 = vector.load %arg2[%c3, %c0_57, %c0_58] : memref<6x128x128xf32, #tpu.memory_space<vmem>>, vector<1x128x128xf32>
    %87 = vector.shape_cast %86 : vector<1x128x128xf32> to vector<128x128xf32>
    %88 = arith.mulf %87, %87 : vector<128x128xf32>
    %cst_59 = arith.constant dense<0.000000e+00> : vector<128xf32>
    %89 = vector.multi_reduction <add>, %88, %cst_59 [0] : vector<128x128xf32> to vector<128xf32>
    %90 = vector.shape_cast %89 : vector<128xf32> to vector<1x128xf32>
    %cst_60 = arith.constant 1.000000e-30 : f32
    %91 = vector.broadcast %cst_60 : f32 to vector<1x128xf32>
    %92 = arith.maximumf %90, %91 : vector<1x128xf32>
    %c3_61 = arith.constant 3 : index
    %c0_62 = arith.constant 0 : index
    %c0_63 = arith.constant 0 : index
    %93 = vector.load %arg3[%c3_61, %c0_62, %c0_63] : memref<6x1x128xf32, #tpu.memory_space<vmem>>, vector<1x1x128xf32>
    %94 = vector.shape_cast %93 : vector<1x1x128xf32> to vector<1x128xf32>
    %95 = math.rsqrt %92 : vector<1x128xf32>
    %96 = arith.mulf %94, %95 : vector<1x128xf32>
    %97 = vector.broadcast %96 : vector<1x128xf32> to vector<128x128xf32>
    %98 = arith.mulf %87, %97 : vector<128x128xf32>
    %c0_64 = arith.constant 0 : index
    %c0_65 = arith.constant 0 : index
    %99 = vector.load %arg8[%c0_64, %c0_65] : memref<8x128xf32, #tpu.memory_space<vmem>>, vector<8x128xf32>
    %cst_66 = arith.constant dense<0.000000e+00> : vector<8x128xf32>
    %100 = tpu.matmul %99, %98, %cst_66 {dimension_numbers = #tpu.dot_dimension_numbers<[1], [0], [0], [1], [0, 0, 1, 1], [], []>} : vector<8x128xf32>, vector<128x128xf32>, vector<8x128xf32> -> vector<8x128xf32>
    %c3_67 = arith.constant 3 : index
    %c0_68 = arith.constant 0 : index
    %c0_69 = arith.constant 0 : index
    %101 = vector.load %arg4[%c3_67, %c0_68, %c0_69] : memref<6x1x128xf32, #tpu.memory_space<vmem>>, vector<1x1x128xf32>
    %102 = vector.shape_cast %101 : vector<1x1x128xf32> to vector<1x128xf32>
    %103 = vector.broadcast %102 : vector<1x128xf32> to vector<8x128xf32>
    %104 = arith.addf %100, %103 : vector<8x128xf32>
    %cst_70 = arith.constant 0.000000e+00 : f32
    %105 = vector.broadcast %cst_70 : f32 to vector<8x128xf32>
    %106 = arith.subf %105, %104 : vector<8x128xf32>
    %107 = math.exp %106 : vector<8x128xf32>
    %cst_71 = arith.constant 1.000000e+00 : f32
    %108 = vector.broadcast %cst_71 : f32 to vector<8x128xf32>
    %109 = arith.addf %108, %107 : vector<8x128xf32>
    %cst_72 = arith.constant 1.000000e+00 : f32
    %110 = vector.broadcast %cst_72 : f32 to vector<8x128xf32>
    %111 = arith.divf %110, %109 : vector<8x128xf32>
    %112 = arith.mulf %104, %111 : vector<8x128xf32>
    %c0_73 = arith.constant 0 : index
    %c0_74 = arith.constant 0 : index
    %113 = vector.load %arg8[%c0_73, %c0_74] : memref<8x128xf32, #tpu.memory_space<vmem>>, vector<8x128xf32>
    tpu.vector_store %arg8[%c0_73, %c0_74], %112 {strides = array<i32>} : memref<8x128xf32, #tpu.memory_space<vmem>>, vector<8x128xf32>,
    %c4 = arith.constant 4 : index
    %c0_75 = arith.constant 0 : index
    %c0_76 = arith.constant 0 : index
    %114 = vector.load %arg2[%c4, %c0_75, %c0_76] : memref<6x128x128xf32, #tpu.memory_space<vmem>>, vector<1x128x128xf32>
    %115 = vector.shape_cast %114 : vector<1x128x128xf32> to vector<128x128xf32>
    %116 = arith.mulf %115, %115 : vector<128x128xf32>
    %cst_77 = arith.constant dense<0.000000e+00> : vector<128xf32>
    %117 = vector.multi_reduction <add>, %116, %cst_77 [0] : vector<128x128xf32> to vector<128xf32>
    %118 = vector.shape_cast %117 : vector<128xf32> to vector<1x128xf32>
    %cst_78 = arith.constant 1.000000e-30 : f32
    %119 = vector.broadcast %cst_78 : f32 to vector<1x128xf32>
    %120 = arith.maximumf %118, %119 : vector<1x128xf32>
    %c4_79 = arith.constant 4 : index
    %c0_80 = arith.constant 0 : index
    %c0_81 = arith.constant 0 : index
    %121 = vector.load %arg3[%c4_79, %c0_80, %c0_81] : memref<6x1x128xf32, #tpu.memory_space<vmem>>, vector<1x1x128xf32>
    %122 = vector.shape_cast %121 : vector<1x1x128xf32> to vector<1x128xf32>
    %123 = math.rsqrt %120 : vector<1x128xf32>
    %124 = arith.mulf %122, %123 : vector<1x128xf32>
    %125 = vector.broadcast %124 : vector<1x128xf32> to vector<128x128xf32>
    %126 = arith.mulf %115, %125 : vector<128x128xf32>
    %c0_82 = arith.constant 0 : index
    %c0_83 = arith.constant 0 : index
    %127 = vector.load %arg8[%c0_82, %c0_83] : memref<8x128xf32, #tpu.memory_space<vmem>>, vector<8x128xf32>
    %cst_84 = arith.constant dense<0.000000e+00> : vector<8x128xf32>
    %128 = tpu.matmul %127, %126, %cst_84 {dimension_numbers = #tpu.dot_dimension_numbers<[1], [0], [0], [1], [0, 0, 1, 1], [], []>} : vector<8x128xf32>, vector<128x128xf32>, vector<8x128xf32> -> vector<8x128xf32>
    %c4_85 = arith.constant 4 : index
    %c0_86 = arith.constant 0 : index
    %c0_87 = arith.constant 0 : index
    %129 = vector.load %arg4[%c4_85, %c0_86, %c0_87] : memref<6x1x128xf32, #tpu.memory_space<vmem>>, vector<1x1x128xf32>
    %130 = vector.shape_cast %129 : vector<1x1x128xf32> to vector<1x128xf32>
    %131 = vector.broadcast %130 : vector<1x128xf32> to vector<8x128xf32>
    %132 = arith.addf %128, %131 : vector<8x128xf32>
    %cst_88 = arith.constant 0.000000e+00 : f32
    %133 = vector.broadcast %cst_88 : f32 to vector<8x128xf32>
    %134 = arith.subf %133, %132 : vector<8x128xf32>
    %135 = math.exp %134 : vector<8x128xf32>
    %cst_89 = arith.constant 1.000000e+00 : f32
    %136 = vector.broadcast %cst_89 : f32 to vector<8x128xf32>
    %137 = arith.addf %136, %135 : vector<8x128xf32>
    %cst_90 = arith.constant 1.000000e+00 : f32
    %138 = vector.broadcast %cst_90 : f32 to vector<8x128xf32>
    %139 = arith.divf %138, %137 : vector<8x128xf32>
    %140 = arith.mulf %132, %139 : vector<8x128xf32>
    %c0_91 = arith.constant 0 : index
    %c0_92 = arith.constant 0 : index
    %141 = vector.load %arg8[%c0_91, %c0_92] : memref<8x128xf32, #tpu.memory_space<vmem>>, vector<8x128xf32>
    tpu.vector_store %arg8[%c0_91, %c0_92], %140 {strides = array<i32>} : memref<8x128xf32, #tpu.memory_space<vmem>>, vector<8x128xf32>,
    %c5 = arith.constant 5 : index
    %c0_93 = arith.constant 0 : index
    %c0_94 = arith.constant 0 : index
    %142 = vector.load %arg2[%c5, %c0_93, %c0_94] : memref<6x128x128xf32, #tpu.memory_space<vmem>>, vector<1x128x128xf32>
    %143 = vector.shape_cast %142 : vector<1x128x128xf32> to vector<128x128xf32>
    %144 = arith.mulf %143, %143 : vector<128x128xf32>
    %cst_95 = arith.constant dense<0.000000e+00> : vector<128xf32>
    %145 = vector.multi_reduction <add>, %144, %cst_95 [0] : vector<128x128xf32> to vector<128xf32>
    %146 = vector.shape_cast %145 : vector<128xf32> to vector<1x128xf32>
    %cst_96 = arith.constant 1.000000e-30 : f32
    %147 = vector.broadcast %cst_96 : f32 to vector<1x128xf32>
    %148 = arith.maximumf %146, %147 : vector<1x128xf32>
    %c5_97 = arith.constant 5 : index
    %c0_98 = arith.constant 0 : index
    %c0_99 = arith.constant 0 : index
    %149 = vector.load %arg3[%c5_97, %c0_98, %c0_99] : memref<6x1x128xf32, #tpu.memory_space<vmem>>, vector<1x1x128xf32>
    %150 = vector.shape_cast %149 : vector<1x1x128xf32> to vector<1x128xf32>
    %151 = math.rsqrt %148 : vector<1x128xf32>
    %152 = arith.mulf %150, %151 : vector<1x128xf32>
    %153 = vector.broadcast %152 : vector<1x128xf32> to vector<128x128xf32>
    %154 = arith.mulf %143, %153 : vector<128x128xf32>
    %c0_100 = arith.constant 0 : index
    %c0_101 = arith.constant 0 : index
    %155 = vector.load %arg8[%c0_100, %c0_101] : memref<8x128xf32, #tpu.memory_space<vmem>>, vector<8x128xf32>
    %cst_102 = arith.constant dense<0.000000e+00> : vector<8x128xf32>
    %156 = tpu.matmul %155, %154, %cst_102 {dimension_numbers = #tpu.dot_dimension_numbers<[1], [0], [0], [1], [0, 0, 1, 1], [], []>} : vector<8x128xf32>, vector<128x128xf32>, vector<8x128xf32> -> vector<8x128xf32>
    %c5_103 = arith.constant 5 : index
    %c0_104 = arith.constant 0 : index
    %c0_105 = arith.constant 0 : index
    %157 = vector.load %arg4[%c5_103, %c0_104, %c0_105] : memref<6x1x128xf32, #tpu.memory_space<vmem>>, vector<1x1x128xf32>
    %158 = vector.shape_cast %157 : vector<1x1x128xf32> to vector<1x128xf32>
    %159 = vector.broadcast %158 : vector<1x128xf32> to vector<8x128xf32>
    %160 = arith.addf %156, %159 : vector<8x128xf32>
    %cst_106 = arith.constant 0.000000e+00 : f32
    %161 = vector.broadcast %cst_106 : f32 to vector<8x128xf32>
    %162 = arith.subf %161, %160 : vector<8x128xf32>
    %163 = math.exp %162 : vector<8x128xf32>
    %cst_107 = arith.constant 1.000000e+00 : f32
    %164 = vector.broadcast %cst_107 : f32 to vector<8x128xf32>
    %165 = arith.addf %164, %163 : vector<8x128xf32>
    %cst_108 = arith.constant 1.000000e+00 : f32
    %166 = vector.broadcast %cst_108 : f32 to vector<8x128xf32>
    %167 = arith.divf %166, %165 : vector<8x128xf32>
    %168 = arith.mulf %160, %167 : vector<8x128xf32>
    %c0_109 = arith.constant 0 : index
    %c0_110 = arith.constant 0 : index
    %169 = vector.load %arg8[%c0_109, %c0_110] : memref<8x128xf32, #tpu.memory_space<vmem>>, vector<8x128xf32>
    tpu.vector_store %arg8[%c0_109, %c0_110], %168 {strides = array<i32>} : memref<8x128xf32, #tpu.memory_space<vmem>>, vector<8x128xf32>,
    %c0_111 = arith.constant 0 : index
    %c0_112 = arith.constant 0 : index
    %170 = vector.load %arg8[%c0_111, %c0_112] : memref<8x128xf32, #tpu.memory_space<vmem>>, vector<8x128xf32>
    %c0_113 = arith.constant 0 : index
    %c0_114 = arith.constant 0 : index
    %171 = vector.load %arg5[%c0_113, %c0_114] : memref<128x128xf32, #tpu.memory_space<vmem>>, vector<128x128xf32>
    %cst_115 = arith.constant dense<0.000000e+00> : vector<8x128xf32>
    %172 = tpu.matmul %170, %171, %cst_115 {dimension_numbers = #tpu.dot_dimension_numbers<[1], [0], [0], [1], [0, 0, 1, 1], [], []>} : vector<8x128xf32>, vector<128x128xf32>, vector<8x128xf32> -> vector<8x128xf32>
    %c0_116 = arith.constant 0 : index
    %c0_117 = arith.constant 0 : index
    %173 = vector.load %arg6[%c0_116, %c0_117] : memref<1x128xf32, #tpu.memory_space<vmem>>, vector<1x128xf32>
    %174 = vector.broadcast %173 : vector<1x128xf32> to vector<8x128xf32>
    %175 = arith.addf %172, %174 : vector<8x128xf32>
    %cst_118 = arith.constant 0.000000e+00 : f32
    %176 = vector.broadcast %cst_118 : f32 to vector<8x128xf32>
    %177 = arith.subf %176, %175 : vector<8x128xf32>
    %178 = math.exp %177 : vector<8x128xf32>
    %cst_119 = arith.constant 1.000000e+00 : f32
    %179 = vector.broadcast %cst_119 : f32 to vector<8x128xf32>
    %180 = arith.addf %179, %178 : vector<8x128xf32>
    %cst_120 = arith.constant 1.000000e+00 : f32
    %181 = vector.broadcast %cst_120 : f32 to vector<8x128xf32>
    %182 = arith.divf %181, %180 : vector<8x128xf32>
    %c0_121 = arith.constant 0 : index
    %c0_122 = arith.constant 0 : index
    %183 = vector.load %arg7[%c0_121, %c0_122] : memref<8x128xf32, #tpu.memory_space<vmem>>, vector<8x128xf32>
    tpu.vector_store %arg7[%c0_121, %c0_122], %182 {strides = array<i32>} : memref<8x128xf32, #tpu.memory_space<vmem>>, vector<8x128xf32>,
    return
  }
  func.func @transform_0(%arg0: i32) -> (i32, i32) {
    %c0_i32 = arith.constant 0 : i32
    %c0_i32_0 = arith.constant 0 : i32
    return %arg0, %c0_i32 : i32, i32
  }
  func.func @transform_1(%arg0: i32) -> (i32, i32, i32) {
    %c0_i32 = arith.constant 0 : i32
    %c0_i32_0 = arith.constant 0 : i32
    %c0_i32_1 = arith.constant 0 : i32
    %c0_i32_2 = arith.constant 0 : i32
    return %c0_i32, %c0_i32_0, %c0_i32_1 : i32, i32, i32
  }
  func.func @transform_2(%arg0: i32) -> (i32, i32, i32) {
    %c0_i32 = arith.constant 0 : i32
    %c0_i32_0 = arith.constant 0 : i32
    %c0_i32_1 = arith.constant 0 : i32
    %c0_i32_2 = arith.constant 0 : i32
    return %c0_i32, %c0_i32_0, %c0_i32_1 : i32, i32, i32
  }
  func.func @transform_3(%arg0: i32) -> (i32, i32, i32) {
    %c0_i32 = arith.constant 0 : i32
    %c0_i32_0 = arith.constant 0 : i32
    %c0_i32_1 = arith.constant 0 : i32
    %c0_i32_2 = arith.constant 0 : i32
    return %c0_i32, %c0_i32_0, %c0_i32_1 : i32, i32, i32
  }
  func.func @transform_4(%arg0: i32) -> (i32, i32) {
    %c0_i32 = arith.constant 0 : i32
    %c0_i32_0 = arith.constant 0 : i32
    %c0_i32_1 = arith.constant 0 : i32
    return %c0_i32, %c0_i32_0 : i32, i32
  }
  func.func @transform_5(%arg0: i32) -> (i32, i32) {
    %c0_i32 = arith.constant 0 : i32
    %c0_i32_0 = arith.constant 0 : i32
    %c0_i32_1 = arith.constant 0 : i32
    return %c0_i32, %c0_i32_0 : i32, i32
  }
  func.func @transform_6(%arg0: i32) -> (i32, i32) {
    %c0_i32 = arith.constant 0 : i32
    %c0_i32_0 = arith.constant 0 : i32
    return %arg0, %c0_i32 : i32, i32
  }
}

</mosaic_0001>

<bundles_post_ra>
// kernel: tpu_custom_call.1
= control target key start
LH: loop header
LB: loop body
LE: loop exit
PB: predicated region body
PF: predicated region fallthrough
CT: control target
= control target key end

     0   :  { %11 = vsyncpa [#allocation5], 0  ;;  %s2128_s0 = inlined_call_operand.hbm [shape: f32[8,128], index: 0, kind: input, shape index: {}]   ;;  %s2129_s1 = inlined_call_operand.hbm [shape: f32[6,128,128], index: 1, kind: input, shape index: {}]   ;;  %s2130_s2 = inlined_call_operand.vmem [shape: f32[6,1,128], index: 2, kind: input, shape index: {}]   ;;  %s2131_s3 = inlined_call_operand.hbm [shape: f32[6,1,128], index: 3, kind: input, shape index: {}]   ;;  %s2132_s4 = inlined_call_operand.hbm [shape: f32[128,128], index: 4, kind: input, shape index: {}]   ;;  %s2133_s5 = inlined_call_operand.vmem [shape: f32[1,128], index: 5, kind: input, shape index: {}]   ;;  %s2134_s6 = inlined_call_operand.hbm [shape: f32[8,128], index: 6, kind: output, shape index: {}]  }
   0x1   :  { %12 = vsyncpa [#allocation8], 0 }
   0x2   :  { %13 = vsyncpa [#allocation11], 0 }
   0x3   :  { %14 = vsyncpa [#allocation6], 0  ;;  %s1916_s21 = smov [#allocation7]   ;;  %s1798_s25 = scalar_lea.hbm %s2129_s1, 12288 }
   0x4   :  { %s30_s22 = sshll.u32 %s1916_s21, 4  ;;  %p1799_p0 = scmp.ne.s32.totalorder %s2129_s1, %s1798_s25  ;;  %s31_s22 = int_to_ptr.vmem [resolvable:$true] %s30_s22 }
   0x5   :  { %p1802_p1 = scmp.lt.u32.totalorder %s1798_s25, %s2129_s1 }
   0x7   :  { %p1804_p2 = pnand %p1802_p1, %p1799_p0 }
   0x9   :  { %1807 = shalt.err (!%p1804_p2)
}
   0xa   :  { %s1808_s30 = scalar_lea.vmem %s31_s22, 12288  ;;  %p1813_p4 = scmp.lt.s32.totalorder %s31_s22, %s31_s22 }
   0xb   :  { %p1809_p3 = scmp.ne.s32.totalorder %s31_s22, %s1808_s30  ;;  %p1814_p5 = scmp.lt.s32.totalorder %s1808_s30, %s1808_s30 }
   0xd   :  { %p1815_p6 = por %p1814_p5, %p1813_p4 }
   0xf   :  { %p1816_p7 = pnand %p1815_p6, %p1809_p3 }
  0x11   :  { %1819 = shalt.err (!%p1816_p7)
}
  0x12   :  { %s1917_s7 = smov 128   ;;  %s1918_s8 = smov 8  }
  0x13   :  { %36 = dma.hbm_to_vmem [thread:$0]  %s2129_s1, 12288, %s31_s22, [#allocation8], %s1917_s7, %s1917_s7, %s1918_s8  }
  0x14   :  { %s1919_s11 = smov [#allocation4]   ;;  %s1920_s13 = smov [#allocation9]  }
  0x15   :  { %s21_s12 = sshll.u32 %s1919_s11, 4  ;;  %s44_s14 = sshll.u32 %s1920_s13, 4  ;;  %s22_s12 = int_to_ptr.vmem [resolvable:$true] %s21_s12  ;;  %s45_s14 = int_to_ptr.vmem [resolvable:$true] %s44_s14 }
  0x16   :  { %s1820_s17 = scalar_lea.hbm %s2128_s0, 128 }
  0x17   :  { %p1821_p8 = scmp.ne.s32.totalorder %s2128_s0, %s1820_s17  ;;  %p1824_p9 = scmp.lt.u32.totalorder %s1820_s17, %s2128_s0 }
  0x19   :  { %p1826_p10 = pnand %p1824_p9, %p1821_p8 }
  0x1b   :  { %1829 = shalt.err (!%p1826_p10)
}
  0x1c   :  { %s1830_s1 = scalar_lea.vmem %s22_s12, 128  ;;  %p1835_p12 = scmp.lt.s32.totalorder %s22_s12, %s22_s12 }
  0x1d   :  { %p1831_p11 = scmp.ne.s32.totalorder %s22_s12, %s1830_s1  ;;  %p1836_p13 = scmp.lt.s32.totalorder %s1830_s1, %s1830_s1 }
  0x1f   :  { %p1837_p0 = por %p1836_p13, %p1835_p12 }
  0x21   :  { %p1838_p1 = pnand %p1837_p0, %p1831_p11 }
  0x23   :  { %1841 = shalt.err (!%p1838_p1)
}
  0x24   :  { %24 = dma.hbm_to_vmem [thread:$0]  %s2128_s0, 128, %s22_s12, [#allocation5]  }
  0x25   :  { %s1842_s26 = scalar_lea.hbm %s2131_s3, 96 }
  0x26   :  { %p1843_p2 = scmp.ne.s32.totalorder %s2131_s3, %s1842_s26  ;;  %p1846_p3 = scmp.lt.u32.totalorder %s1842_s26, %s2131_s3 }
  0x28   :  { %p1848_p4 = pnand %p1846_p3, %p1843_p2 }
  0x2a   :  { %1851 = shalt.err (!%p1848_p4)
}
  0x2b   :  { %s1852_s9 = scalar_lea.vmem %s45_s14, 96  ;;  %p1857_p6 = scmp.lt.s32.totalorder %s45_s14, %s45_s14 }
  0x2c   :  { %p1853_p5 = scmp.ne.s32.totalorder %s45_s14, %s1852_s9  ;;  %p1858_p7 = scmp.lt.s32.totalorder %s1852_s9, %s1852_s9 }
  0x2e   :  { %p1859_p8 = por %p1858_p7, %p1857_p6 }
  0x30   :  { %p1860_p9 = pnand %p1859_p8, %p1853_p5 }
  0x32   :  { %1863 = shalt.err (!%p1860_p9)
}
  0x33   :  { %s1921_s0 = smov 16   ;;  %s1922_s10 = smov 1  }
  0x34   :  { %50 = dma.hbm_to_vmem [thread:$0]  %s2131_s3, 96, %s45_s14, [#allocation8], %s1921_s0, %s1921_s0, %s1922_s10  }
  0x35   :  { %s1923_s13 = smov [#allocation10]   ;;  %s1864_s18 = scalar_lea.hbm %s2132_s4, 2048 }
  0x36   :  { %s56_s15 = sshll.u32 %s1923_s13, 4  ;;  %p1865_p10 = scmp.ne.s32.totalorder %s2132_s4, %s1864_s18  ;;  %s57_s15 = int_to_ptr.vmem [resolvable:$true] %s56_s15 }
  0x37   :  { %p1868_p11 = scmp.lt.u32.totalorder %s1864_s18, %s2132_s4 }
  0x39   :  { %p1870_p12 = pnand %p1868_p11, %p1865_p10 }
  0x3b   :  { %1873 = shalt.err (!%p1870_p12)
}
  0x3c   :  { %s1874_s22 = scalar_lea.vmem %s57_s15, 2048  ;;  %p1879_p0 = scmp.lt.s32.totalorder %s57_s15, %s57_s15 }
  0x3d   :  { %p1875_p13 = scmp.ne.s32.totalorder %s57_s15, %s1874_s22  ;;  %p1880_p1 = scmp.lt.s32.totalorder %s1874_s22, %s1874_s22 }
  0x3f   :  { %p1881_p2 = por %p1880_p1, %p1879_p0 }
  0x41   :  { %p1882_p3 = pnand %p1881_p2, %p1875_p13 }
  0x43   :  { %1885 = shalt.err (!%p1882_p3)
}
  0x44   :  { %62 = dma.hbm_to_vmem [thread:$0]  %s2132_s4, 2048, %s57_s15, [#allocation11], %s1917_s7, %s1917_s7, %s1918_s8  }
  0x45   :  { %1908 = dma.done.wait [#allocation5], 128  }
  0x46   :  { %1909 = vsyncadd [#allocation5], 4294967168 }
  0x47   :  { %1910 = dma.done.wait [#allocation8], 12384  }
  0x48   :  { %1911 = vsyncadd [#allocation8], 4294954912 }
  0x49   :  { %1912 = dma.done.wait [#allocation11], 2048  }
  0x4a   :  { %1913 = vsyncadd [#allocation11], 4294965248  ;;  %v1924_v0 = vmov 0.0|0.0   ;;  %vm1925_vm0 = vmmov 0   ;;  %v1926_v1 = vmov 0.0   ;;  %v79_v2 = vld [vmem:[#allocation7] sm:$0xff]  ;;  %v137_v56 = vlaneseq }
  0x4b   :  { %1578 = vmatprep.subr.bf16.mxu0 %v1924_v0  ;;  %1365 = vmatprep.mubr.msk.f32.mxu0 %vm1925_vm0, %v1926_v1  ;;  %v80_v3 = vld [vmem:[#allocation7 + $0x8] sm:$0xff]  ;;  %v81_v4 = vld [vmem:[#allocation7 + $0x10] sm:$0xff]  ;;  %v82_v5 = vld [vmem:[#allocation7 + $0x18] sm:$0xff]  ;;  %v95_v6 = vmul.f32 %v79_v2, %v79_v2  ;;  %s1927_s10 = smov [#allocation12]  }
  0x4c   :  { %1602 = vmatprep.subr.bf16.mxu1 %v1924_v0  ;;  %1400 = vmatprep.mubr.msk.f32.mxu1 %vm1925_vm0, %v1926_v1  ;;  %v96_v7 = vmul.f32 %v80_v3, %v80_v3  ;;  %v97_v8 = vmul.f32 %v81_v4, %v81_v4  ;;  %v83_v9 = vld [vmem:[#allocation7 + $0x20] sm:$0xff]  ;;  %v98_v10 = vmul.f32 %v82_v5, %v82_v5  ;;  %v84_v12 = vld [vmem:[#allocation7 + $0x28] sm:$0xff]  ;;  %v85_v15 = vld [vmem:[#allocation7 + $0x30] sm:$0xff]  ;;  %v138_v57 = vshrl.u32 %v137_v56, 7  ;;  %s1191_s11 = sshll.u32 %s1927_s10, 4  ;;  %s1192_s11 = int_to_ptr.vmem [resolvable:$true] %s1191_s11 }
  0x4d   :  { %v99_v13 = vmul.f32 %v83_v9, %v83_v9  ;;  %v100_v16 = vmul.f32 %v84_v12, %v84_v12  ;;  %v86_v18 = vld [vmem:[#allocation7 + $0x38] sm:$0xff]  ;;  %v101_v19 = vmul.f32 %v85_v15, %v85_v15  ;;  %v87_v21 = vld [vmem:[#allocation7 + $0x40] sm:$0xff]  ;;  %v88_v24 = vld [vmem:[#allocation7 + $0x48] sm:$0xff]  ;;  %s1886_s12 = scalar_lea.vmem %s1192_s11, 128  ;;  %p1891_p5 = scmp.lt.s32.totalorder %s1192_s11, %s1192_s11 }
  0x4e   :  { %v111_v11 = vadd.f32 %v96_v7, %v95_v6  ;;  %v102_v22 = vmul.f32 %v86_v18, %v86_v18  ;;  %v103_v25 = vmul.f32 %v87_v21, %v87_v21  ;;  %v89_v27 = vld [vmem:[#allocation7 + $0x50] sm:$0xff]  ;;  %v104_v28 = vmul.f32 %v88_v24, %v88_v24  ;;  %v90_v30 = vld [vmem:[#allocation7 + $0x58] sm:$0xff]  ;;  %v91_v33 = vld [vmem:[#allocation7 + $0x60] sm:$0xff]  ;;  %p1887_p4 = scmp.ne.s32.totalorder %s1192_s11, %s1886_s12  ;;  %p1892_p6 = scmp.lt.s32.totalorder %s1886_s12, %s1886_s12 }
  0x4f   :  { %v105_v31 = vmul.f32 %v89_v27, %v89_v27  ;;  %v106_v34 = vmul.f32 %v90_v30, %v90_v30  ;;  %v92_v36 = vld [vmem:[#allocation7 + $0x68] sm:$0xff]  ;;  %v107_v37 = vmul.f32 %v91_v33, %v91_v33  ;;  %v93_v39 = vld [vmem:[#allocation7 + $0x70] sm:$0xff]  ;;  %v94_v42 = vld [vmem:[#allocation7 + $0x78] sm:$0xff]  ;;  %v2026_v59 = vsub.s32 0, %v138_v57 }
  0x50   :  { %v112_v14 = vadd.f32 %v111_v11, %v97_v8  ;;  %v108_v40 = vmul.f32 %v92_v36, %v92_v36  ;;  %v109_v43 = vmul.f32 %v93_v39, %v93_v39  ;;  %v110_v45 = vmul.f32 %v94_v42, %v94_v42  ;;  %v133_v58 = vld [vmem:[%s2130_s2] sm:$0x1]  ;;  %p1893_p7 = por %p1892_p6, %p1891_p5 }
  0x51   :  { %v256_v57 = vld [vmem:[#allocation7 + $0xd8] sm:$0xff] }
  0x52   :  { %v113_v17 = vadd.f32 %v112_v14, %v98_v10  ;;  %p1894_p8 = pnand %p1893_p7, %p1887_p4 }
  0x54   :  { %v114_v20 = vadd.f32 %v113_v17, %v99_v13 }
  0x56   :  { %v115_v23 = vadd.f32 %v114_v20, %v100_v16 }
  0x58   :  { %v116_v26 = vadd.f32 %v115_v23, %v101_v19 }
  0x5a   :  { %v117_v29 = vadd.f32 %v116_v26, %v102_v22  ;;  %v245_v26 = vld [vmem:[#allocation7 + $0x80] sm:$0xff] }
  0x5c   :  { %v118_v32 = vadd.f32 %v117_v29, %v103_v25 }
  0x5e   :  { %v119_v35 = vadd.f32 %v118_v32, %v104_v28  ;;  %v261_v28 = vmul.f32 %v245_v26, %v245_v26 }
  0x60   :  { %v120_v38 = vadd.f32 %v119_v35, %v105_v31 }
  0x62   :  { %v121_v41 = vadd.f32 %v120_v38, %v106_v34 }
  0x64   :  { %v122_v44 = vadd.f32 %v121_v41, %v107_v37 }
  0x66   :  { %v123_v46 = vadd.f32 %v122_v44, %v108_v40 }
  0x68   :  { %v124_v47 = vadd.f32 %v123_v46, %v109_v43 }
  0x6a   :  { %v125_v48 = vadd.f32 %v124_v47, %v110_v45  ;;  %v252_v45 = vld [vmem:[#allocation7 + $0xb8] sm:$0xff] }
  0x6b   :  { %v268_v46 = vmul.f32 %v252_v45, %v252_v45 }
  0x6c   :  { %v126_v49 = vrot.slane %v125_v48, 4 }
  0x6e   :  { %v127_v50 = vadd.f32 %v126_v49, %v125_v48  ;;  %v253_v48 = vld [vmem:[#allocation7 + $0xc0] sm:$0xff] }
  0x6f   :  { %v269_v49 = vmul.f32 %v253_v48, %v253_v48 }
  0x70   :  { %v128_v51 = vrot.slane %v127_v50, 2 }
  0x72   :  { %v129_v52 = vadd.f32 %v128_v51, %v127_v50  ;;  %v254_v51 = vld [vmem:[#allocation7 + $0xc8] sm:$0xff] }
  0x74   :  { %v130_v53 = vrot.slane %v129_v52, 1 }
  0x76   :  { %v131_v54 = vadd.f32 %v130_v53, %v129_v52  ;;  %v270_v52 = vmul.f32 %v254_v51, %v254_v51 }
  0x78   :  { %v132_v55 = vmax.f32 %v131_v54, 1e-30  ;;  %v255_v54 = vld [vmem:[#allocation7 + $0xd0] sm:$0xff] }
  0x7a   :  { %1758 = vrsqrt.f32 %v132_v55  ;;  %v271_v55 = vmul.f32 %v255_v54, %v255_v54 }
  0x84   :  { %v1759_v60 = vpop.eup %1758 }
  0x85   :  { %v135_v61 = vmul.f32 %v1759_v60, %v133_v58  ;;  %v272_v58 = vmul.f32 %v256_v57, %v256_v57 }
  0x87   :  { %v140_v62 = vrot.slane %v135_v61, %v2026_v59  ;;  %v257_v61 = vld [vmem:[#allocation7 + $0xe0] sm:$0xff] }
  0x89   :  { %v142_v63 = vmul.f32 %v140_v62, %v79_v2  ;;  %v143_v6 = vmul.f32 %v140_v62, %v80_v3  ;;  %v144_v7 = vmul.f32 %v140_v62, %v81_v4  ;;  %v145_v8 = vmul.f32 %v140_v62, %v82_v5 }
  0x8a   :  { %v146_v13 = vmul.f32 %v140_v62, %v83_v9  ;;  %v147_v14 = vmul.f32 %v140_v62, %v84_v12  ;;  %v148_v17 = vmul.f32 %v140_v62, %v85_v15  ;;  %v149_v19 = vmul.f32 %v140_v62, %v86_v18 }
  0x8b   :  { %v1579_v10 = vpack.c.bf16 %v143_v6, %v142_v63  ;;  %v1582_v11 = vpack.c.bf16 %v145_v8, %v144_v7  ;;  %v150_v22 = vmul.f32 %v140_v62, %v87_v21  ;;  %v151_v2 = vmul.f32 %v140_v62, %v88_v24  ;;  %v77_v24 = vld [vmem:[#allocation4] sm:$0xff]  ;;  %v258_v6 = vld [vmem:[#allocation7 + $0xe8] sm:$0xff] }
  0x8c   :  { %v1585_v16 = vpack.c.bf16 %v147_v14, %v146_v13  ;;  %v1588_v20 = vpack.c.bf16 %v149_v19, %v148_v17  ;;  %v152_v4 = vmul.f32 %v140_v62, %v89_v27  ;;  %v153_v5 = vmul.f32 %v140_v62, %v90_v30  ;;  %v246_v27 = vld [vmem:[#allocation7 + $0x88] sm:$0xff]  ;;  %v247_v30 = vld [vmem:[#allocation7 + $0x90] sm:$0xff]  ;;  %v260_v14 = vld [vmem:[#allocation7 + $0xf8] sm:$0xff] }
  0x8d   :  { %1580 = vmatpush3.bf16.msra.mxu0 %v1579_v10  ;;  %v1591_v3 = vpack.c.bf16 %v151_v2, %v150_v22  ;;  %v154_v12 = vmul.f32 %v140_v62, %v91_v33  ;;  %v155_v23 = vmul.f32 %v140_v62, %v92_v36  ;;  %v156_v18 = vmul.f32 %v140_v62, %v93_v39  ;;  %v248_v33 = vld [vmem:[#allocation7 + $0x98] sm:$0xff]  ;;  %v249_v36 = vld [vmem:[#allocation7 + $0xa0] sm:$0xff]  ;;  %v250_v39 = vld [vmem:[#allocation7 + $0xa8] sm:$0xff] }
  0x8e   :  { %1581 = vmatprep.subr.bf16.mxu0 %v1924_v0  ;;  %v1594_v9 = vpack.c.bf16 %v153_v5, %v152_v4  ;;  %v157_v25 = vmul.f32 %v140_v62, %v94_v42  ;;  %v262_v29 = vmul.f32 %v246_v27, %v246_v27  ;;  %v263_v31 = vmul.f32 %v247_v30, %v247_v30  ;;  %v251_v42 = vld [vmem:[#allocation7 + $0xb0] sm:$0xff] }
  0x8f   :  { %v1597_v15 = vpack.c.bf16 %v155_v23, %v154_v12  ;;  %v264_v34 = vmul.f32 %v248_v33, %v248_v33  ;;  %v265_v37 = vmul.f32 %v249_v36, %v249_v36  ;;  %v266_v40 = vmul.f32 %v250_v39, %v250_v39  ;;  %v259_v10 = vld [vmem:[#allocation7 + $0xf0] sm:$0xff]  ;;  %v1203_v23 = vld [vmem:[%s2130_s2 + $0x1] sm:$0x1] }
  0x90   :  { %v1600_v21 = vpack.c.bf16 %v157_v25, %v156_v18  ;;  %v277_v32 = vadd.f32 %v262_v29, %v261_v28  ;;  %v267_v43 = vmul.f32 %v251_v42, %v251_v42  ;;  %v273_v62 = vmul.f32 %v257_v61, %v257_v61 }
  0x91   :  { %1583 = vmatpush3.bf16.msra.mxu0 %v1582_v11  ;;  %v274_v7 = vmul.f32 %v258_v6, %v258_v6  ;;  %v275_v11 = vmul.f32 %v259_v10, %v259_v10 }
  0x92   :  { %1584 = vmatprep.subr.bf16.mxu0 %v1924_v0  ;;  %v278_v35 = vadd.f32 %v277_v32, %v263_v31 }
  0x94   :  { %v279_v38 = vadd.f32 %v278_v35, %v264_v34 }
  0x95   :  { %1586 = vmatpush3.bf16.msra.mxu0 %v1585_v16  ;;  %v276_v16 = vmul.f32 %v260_v14, %v260_v14 }
  0x96   :  { %1587 = vmatprep.subr.bf16.mxu0 %v1924_v0  ;;  %v280_v41 = vadd.f32 %v279_v38, %v265_v37 }
  0x98   :  { %v281_v44 = vadd.f32 %v280_v41, %v266_v40 }
  0x99   :  { %1589 = vmatpush3.bf16.msra.mxu0 %v1588_v20 }
  0x9a   :  { %1590 = vmatprep.subr.bf16.mxu0 %v1924_v0  ;;  %v282_v47 = vadd.f32 %v281_v44, %v267_v43 }
  0x9c   :  { %v283_v50 = vadd.f32 %v282_v47, %v268_v46  ;;  %v1202_v47 = vld [vmem:[#allocation9] ss:$0 sm:$0xff] }
  0x9d   :  { %1592 = vmatpush3.bf16.msra.mxu0 %v1591_v3 }
  0x9e   :  { %1593 = vmatprep.subr.bf16.mxu0 %v1924_v0  ;;  %v284_v53 = vadd.f32 %v283_v50, %v269_v49 }
  0xa0   :  { %v285_v56 = vadd.f32 %v284_v53, %v270_v52 }
  0xa1   :  { %1595 = vmatpush3.bf16.msra.mxu0 %v1594_v9 }
  0xa2   :  { %1596 = vmatprep.subr.bf16.mxu0 %v1924_v0  ;;  %v286_v60 = vadd.f32 %v285_v56, %v271_v55 }
  0xa4   :  { %v287_v63 = vadd.f32 %v286_v60, %v272_v58  ;;  %v414_v58 = vld [vmem:[#allocation7 + $0x108] sm:$0xff] }
  0xa5   :  { %1598 = vmatpush3.bf16.msra.mxu0 %v1597_v15 }
  0xa6   :  { %1599 = vmatprep.subr.bf16.mxu0 %v1924_v0  ;;  %v288_v8 = vadd.f32 %v287_v63, %v273_v62  ;;  %v415_v62 = vld [vmem:[#allocation7 + $0x110] sm:$0xff] }
  0xa7   :  { %v431_v63 = vmul.f32 %v415_v62, %v415_v62 }
  0xa8   :  { %v289_v13 = vadd.f32 %v288_v8, %v274_v7  ;;  %v416_v7 = vld [vmem:[#allocation7 + $0x118] sm:$0xff] }
  0xa9   :  { %1601 = vmatpush3.bf16.msra.mxu0 %v1600_v21  ;;  %v432_v8 = vmul.f32 %v416_v7, %v416_v7 }
  0xaa   :  { %1626 = vmatprep.subr.bf16.mxu0 %v1924_v0  ;;  %v290_v17 = vadd.f32 %v289_v13, %v275_v11  ;;  %v417_v11 = vld [vmem:[#allocation7 + $0x120] sm:$0xff] }
  0xab   :  { %v433_v13 = vmul.f32 %v417_v11, %v417_v11 }
  0xac   :  { %1366 = vmatmul.mubr.f32.vlgmr.msra.gmra.mrb[0].mxu0 %v77_v24  ;;  %v291_v19 = vadd.f32 %v290_v17, %v276_v16  ;;  %v418_v16 = vld [vmem:[#allocation7 + $0x128] sm:$0xff] }
  0xad   :  { %1435 = vmatprep.mubr.msk.f32.mxu0 %vm1925_vm0, %v1926_v1  ;;  %v434_v17 = vmul.f32 %v418_v16, %v418_v16 }
  0xae   :  { %v292_v20 = vrot.slane %v291_v19, 4 }
  0xb0   :  { %v293_v22 = vadd.f32 %v292_v20, %v291_v19  ;;  %v419_v20 = vld [vmem:[#allocation7 + $0x130] sm:$0xff] }
  0xb2   :  { %v294_v2 = vrot.slane %v293_v22, 2 }
  0xb4   :  { %v295_v3 = vadd.f32 %v294_v2, %v293_v22  ;;  %v435_v22 = vmul.f32 %v419_v20, %v419_v20 }
  0xb6   :  { %v296_v4 = vrot.slane %v295_v3, 1 }
  0xb8   :  { %v297_v5 = vadd.f32 %v296_v4, %v295_v3  ;;  %v420_v3 = vld [vmem:[#allocation7 + $0x138] sm:$0xff] }
  0xb9   :  { %v436_v4 = vmul.f32 %v420_v3, %v420_v3 }
  0xba   :  { %v298_v9 = vmax.f32 %v297_v5, 1e-30 }
  0xbc   :  { %1760 = vrsqrt.f32 %v298_v9  ;;  %v421_v9 = vld [vmem:[#allocation7 + $0x140] sm:$0xff] }
  0xc6   :  { %v1761_v12 = vpop.eup %1760 }
  0xc7   :  { %v302_v15 = vmul.f32 %v1761_v12, %v1203_v23  ;;  %v437_v12 = vmul.f32 %v421_v9, %v421_v9 }
  0xc9   :  { %v307_v18 = vrot.slane %v302_v15, %v2026_v59  ;;  %v422_v15 = vld [vmem:[#allocation7 + $0x148] sm:$0xff] }
  0xcb   :  { %v309_v25 = vmul.f32 %v307_v18, %v245_v26  ;;  %v310_v21 = vmul.f32 %v307_v18, %v246_v27  ;;  %v311_v28 = vmul.f32 %v307_v18, %v247_v30  ;;  %v312_v29 = vmul.f32 %v307_v18, %v248_v33 }
  0xcc   :  { %v313_v32 = vmul.f32 %v307_v18, %v249_v36  ;;  %v314_v34 = vmul.f32 %v307_v18, %v250_v39  ;;  %v315_v37 = vmul.f32 %v307_v18, %v251_v42  ;;  %v316_v38 = vmul.f32 %v307_v18, %v252_v45 }
  0xcd   :  { %v1603_v24 = vpack.c.bf16 %v310_v21, %v309_v25  ;;  %v1606_v31 = vpack.c.bf16 %v312_v29, %v311_v28  ;;  %v317_v27 = vmul.f32 %v307_v18, %v253_v48  ;;  %v318_v40 = vmul.f32 %v307_v18, %v254_v51  ;;  %v423_v21 = vld [vmem:[#allocation7 + $0x150] sm:$0xff]  ;;  %v424_v29 = vld [vmem:[#allocation7 + $0x158] sm:$0xff] }
  0xce   :  { %v1609_v35 = vpack.c.bf16 %v314_v34, %v313_v32  ;;  %v1612_v26 = vpack.c.bf16 %v316_v38, %v315_v37  ;;  %v319_v33 = vmul.f32 %v307_v18, %v255_v54  ;;  %v320_v41 = vmul.f32 %v307_v18, %v256_v57  ;;  %v413_v57 = vld [vmem:[#allocation7 + $0x100] sm:$0xff]  ;;  %v426_v38 = vld [vmem:[#allocation7 + $0x168] sm:$0xff] }
  0xcf   :  { %1604 = vmatpush3.bf16.msra.mxu1 %v1603_v24  ;;  %v1615_v30 = vpack.c.bf16 %v318_v40, %v317_v27  ;;  %v321_v39 = vmul.f32 %v307_v18, %v257_v61  ;;  %v322_v43 = vmul.f32 %v307_v18, %v258_v6  ;;  %v323_v44 = vmul.f32 %v307_v18, %v259_v10  ;;  %v425_v34 = vld [vmem:[#allocation7 + $0x160] sm:$0xff]  ;;  %v427_v40 = vld [vmem:[#allocation7 + $0x170] sm:$0xff] }
  0xd0   :  { %1605 = vmatprep.subr.bf16.mxu1 %v1924_v0  ;;  %v1618_v36 = vpack.c.bf16 %v320_v41, %v319_v33  ;;  %v324_v45 = vmul.f32 %v307_v18, %v260_v14  ;;  %v429_v60 = vmul.f32 %v413_v57, %v413_v57  ;;  %v430_v61 = vmul.f32 %v414_v58, %v414_v58  ;;  %v428_v41 = vld [vmem:[#allocation7 + $0x178] sm:$0xff] }
  0xd1   :  { %v1621_v42 = vpack.c.bf16 %v322_v43, %v321_v39  ;;  %v438_v18 = vmul.f32 %v422_v15, %v422_v15  ;;  %v439_v24 = vmul.f32 %v423_v21, %v423_v21 }
  0xd2   :  { %v1624_v46 = vpack.c.bf16 %v324_v45, %v323_v44  ;;  %v445_v6 = vadd.f32 %v430_v61, %v429_v60 }
  0xd3   :  { %1607 = vmatpush3.bf16.msra.mxu1 %v1606_v31  ;;  %v440_v31 = vmul.f32 %v424_v29, %v424_v29 }
  0xd4   :  { %1608 = vmatprep.subr.bf16.mxu1 %v1924_v0  ;;  %v446_v10 = vadd.f32 %v445_v6, %v431_v63 }
  0xd6   :  { %v447_v14 = vadd.f32 %v446_v10, %v432_v8 }
  0xd7   :  { %1610 = vmatpush3.bf16.msra.mxu1 %v1609_v35  ;;  %v441_v35 = vmul.f32 %v425_v34, %v425_v34 }
  0xd8   :  { %1611 = vmatprep.subr.bf16.mxu1 %v1924_v0  ;;  %v448_v19 = vadd.f32 %v447_v14, %v433_v13 }
  0xda   :  { %v449_v2 = vadd.f32 %v448_v19, %v434_v17 }
  0xdb   :  { %1613 = vmatpush3.bf16.msra.mxu1 %v1612_v26  ;;  %v442_v26 = vmul.f32 %v426_v38, %v426_v38 }
  0xdc   :  { %1614 = vmatprep.subr.bf16.mxu1 %v1924_v0  ;;  %v450_v5 = vadd.f32 %v449_v2, %v435_v22 }
  0xde   :  { %v451_v23 = vadd.f32 %v450_v5, %v436_v4  ;;  %v1204_v5 = vld [vmem:[#allocation9 + $0x1] ss:$0 sm:$0xff] }
  0xdf   :  { %1616 = vmatpush3.bf16.msra.mxu1 %v1615_v30  ;;  %v443_v30 = vmul.f32 %v427_v40, %v427_v40 }
  0xe0   :  { %1617 = vmatprep.subr.bf16.mxu1 %v1924_v0  ;;  %v452_v25 = vadd.f32 %v451_v23, %v437_v12 }
  0xe2   :  { %v453_v28 = vadd.f32 %v452_v25, %v438_v18 }
  0xe3   :  { %1619 = vmatpush3.bf16.msra.mxu1 %v1618_v36  ;;  %v444_v36 = vmul.f32 %v428_v41, %v428_v41 }
  0xe4   :  { %1620 = vmatprep.subr.bf16.mxu1 %v1924_v0  ;;  %v454_v32 = vadd.f32 %v453_v28, %v439_v24 }
  0xe6   :  { %v455_v37 = vadd.f32 %v454_v32, %v440_v31  ;;  %v582_v31 = vld [vmem:[#allocation7 + $0x188] sm:$0xff] }
  0xe7   :  { %1622 = vmatpush3.bf16.msra.mxu1 %v1621_v42 }
  0xe8   :  { %1623 = vmatprep.subr.bf16.mxu1 %v1924_v0  ;;  %v456_v27 = vadd.f32 %v455_v37, %v441_v35  ;;  %v583_v35 = vld [vmem:[#allocation7 + $0x190] sm:$0xff] }
  0xe9   :  { %v599_v37 = vmul.f32 %v583_v35, %v583_v35 }
  0xea   :  { %v457_v33 = vadd.f32 %v456_v27, %v442_v26  ;;  %v584_v26 = vld [vmem:[#allocation7 + $0x198] sm:$0xff] }
  0xeb   :  { %1625 = vmatpush3.bf16.msra.mxu1 %v1624_v46  ;;  %v600_v27 = vmul.f32 %v584_v26, %v584_v26 }
  0xec   :  { %1650 = vmatprep.subr.bf16.mxu1 %v1924_v0  ;;  %v458_v39 = vadd.f32 %v457_v33, %v443_v30  ;;  %v585_v30 = vld [vmem:[#allocation7 + $0x1a0] sm:$0xff] }
  0xed   :  { %v601_v33 = vmul.f32 %v585_v30, %v585_v30 }
  0xee   :  { %v459_v43 = vadd.f32 %v458_v39, %v444_v36  ;;  %v586_v36 = vld [vmem:[#allocation7 + $0x1a8] sm:$0xff] }
  0xef   :  { %v602_v39 = vmul.f32 %v586_v36, %v586_v36 }
  0xf0   :  { %v460_v42 = vrot.slane %v459_v43, 4 }
  0xf2   :  { %v461_v44 = vadd.f32 %v460_v42, %v459_v43  ;;  %v587_v42 = vld [vmem:[#allocation7 + $0x1b0] sm:$0xff] }
  0xf4   :  { %v462_v45 = vrot.slane %v461_v44, 2 }
  0xf6   :  { %v463_v46 = vadd.f32 %v462_v45, %v461_v44  ;;  %v603_v44 = vmul.f32 %v587_v42, %v587_v42 }
 0x17f   :  { %v232_v48 = vpop.f32.mrb[0].mxu0 }
 0x180   :  { %v233_v49 = vadd.f32 %v1202_v47, %v232_v48  ;;  %v1367_v50 = vpop.f32.mrb[1].mxu0  ;;  %v464_v47 = vrot.slane %v463_v46, 1 }
 0x182   :  { %v236_v51 = vsub.f32 0.0, %v233_v49  ;;  %v465_v48 = vadd.f32 %v464_v47, %v463_v46  ;;  %v588_v46 = vld [vmem:[#allocation7 + $0x1b8] sm:$0xff] }
 0x183   :  { %v604_v47 = vmul.f32 %v588_v46, %v588_v46 }
 0x184   :  { %v237_v52 = vmul.f32 1.442695, %v236_v51  ;;  %v1205_v51 = vld [vmem:[%s2130_s2 + $0x2] sm:$0x1] }
 0x186   :  { %1762 = vpow2.f32 %v237_v52 }
 0x190   :  { %v1763_v53 = vpop.eup %1762 }
 0x191   :  { %v239_v54 = vadd.f32 1.0, %v1763_v53 }
 0x193   :  { %1764 = vrcp.f32 %v239_v54 }
 0x19d   :  { %v1765_v55 = vpop.eup %1764 }
 0x19e   :  { %v242_v56 = vmul.f32 %v1765_v55, %v233_v49  ;;  %v466_v49 = vmax.f32 %v465_v48, 1e-30 }
 0x1a0   :  { %1401 = vmatmul.mubr.f32.vlgmr.msra.gmra.mrb[0].mxu1 %v242_v56  ;;  %1766 = vrsqrt.f32 %v466_v49  ;;  %v589_v49 = vld [vmem:[#allocation7 + $0x1c0] sm:$0xff] }
 0x1a1   :  { %1470 = vmatprep.mubr.msk.f32.mxu1 %vm1925_vm0, %v1926_v1 }
 0x1aa   :  { %v1767_v50 = vpop.eup %1766 }
 0x1ab   :  { %v470_v52 = vmul.f32 %v1767_v50, %v1205_v51  ;;  %v605_v50 = vmul.f32 %v589_v49, %v589_v49 }
 0x1ad   :  { %v475_v53 = vrot.slane %v470_v52, %v2026_v59  ;;  %v590_v52 = vld [vmem:[#allocation7 + $0x1c8] sm:$0xff] }
 0x1af   :  { %v477_v54 = vmul.f32 %v475_v53, %v413_v57  ;;  %v478_v55 = vmul.f32 %v475_v53, %v414_v58  ;;  %v479_v60 = vmul.f32 %v475_v53, %v415_v62  ;;  %v480_v61 = vmul.f32 %v475_v53, %v416_v7 }
 0x1b0   :  { %v481_v6 = vmul.f32 %v475_v53, %v417_v11  ;;  %v482_v8 = vmul.f32 %v475_v53, %v418_v16  ;;  %v483_v13 = vmul.f32 %v475_v53, %v419_v20  ;;  %v484_v14 = vmul.f32 %v475_v53, %v420_v3 }
 0x1b1   :  { %v1627_v56 = vpack.c.bf16 %v478_v55, %v477_v54  ;;  %v1630_v63 = vpack.c.bf16 %v480_v61, %v479_v60  ;;  %v485_v58 = vmul.f32 %v475_v53, %v421_v9  ;;  %v486_v17 = vmul.f32 %v475_v53, %v422_v15  ;;  %v591_v55 = vld [vmem:[#allocation7 + $0x1d0] sm:$0xff]  ;;  %v592_v61 = vld [vmem:[#allocation7 + $0x1d8] sm:$0xff] }
 0x1b2   :  { %v1633_v10 = vpack.c.bf16 %v482_v8, %v481_v6  ;;  %v1636_v57 = vpack.c.bf16 %v484_v14, %v483_v13  ;;  %v487_v7 = vmul.f32 %v475_v53, %v423_v21  ;;  %v488_v19 = vmul.f32 %v475_v53, %v424_v29  ;;  %v581_v29 = vld [vmem:[#allocation7 + $0x180] sm:$0xff]  ;;  %v594_v14 = vld [vmem:[#allocation7 + $0x1e8] sm:$0xff] }
 0x1b3   :  { %1628 = vmatpush3.bf16.msra.mxu0 %v1627_v56  ;;  %v1639_v62 = vpack.c.bf16 %v486_v17, %v485_v58  ;;  %v489_v16 = vmul.f32 %v475_v53, %v425_v34  ;;  %v490_v22 = vmul.f32 %v475_v53, %v426_v38  ;;  %v491_v2 = vmul.f32 %v475_v53, %v427_v40  ;;  %v593_v8 = vld [vmem:[#allocation7 + $0x1e0] sm:$0xff]  ;;  %v595_v17 = vld [vmem:[#allocation7 + $0x1f0] sm:$0xff] }
 0x1b4   :  { %1629 = vmatprep.subr.bf16.mxu0 %v1924_v0  ;;  %v1642_v11 = vpack.c.bf16 %v488_v19, %v487_v7  ;;  %v492_v3 = vmul.f32 %v475_v53, %v428_v41  ;;  %v597_v32 = vmul.f32 %v581_v29, %v581_v29  ;;  %v598_v34 = vmul.f32 %v582_v31, %v582_v31  ;;  %v596_v19 = vld [vmem:[#allocation7 + $0x1f8] sm:$0xff] }
 0x1b5   :  { %v1645_v20 = vpack.c.bf16 %v490_v22, %v489_v16  ;;  %v606_v53 = vmul.f32 %v590_v52, %v590_v52  ;;  %v607_v56 = vmul.f32 %v591_v55, %v591_v55 }
 0x1b6   :  { %v1648_v4 = vpack.c.bf16 %v492_v3, %v491_v2  ;;  %v613_v38 = vadd.f32 %v598_v34, %v597_v32 }
 0x1b7   :  { %1631 = vmatpush3.bf16.msra.mxu0 %v1630_v63  ;;  %v608_v63 = vmul.f32 %v592_v61, %v592_v61 }
 0x1b8   :  { %1632 = vmatprep.subr.bf16.mxu0 %v1924_v0  ;;  %v614_v40 = vadd.f32 %v613_v38, %v599_v37 }
 0x1ba   :  { %v615_v41 = vadd.f32 %v614_v40, %v600_v27 }
 0x1bb   :  { %1634 = vmatpush3.bf16.msra.mxu0 %v1633_v10  ;;  %v609_v10 = vmul.f32 %v593_v8, %v593_v8 }
 0x1bc   :  { %1635 = vmatprep.subr.bf16.mxu0 %v1924_v0  ;;  %v616_v43 = vadd.f32 %v615_v41, %v601_v33 }
 0x1be   :  { %v617_v45 = vadd.f32 %v616_v43, %v602_v39 }
 0x1bf   :  { %1637 = vmatpush3.bf16.msra.mxu0 %v1636_v57  ;;  %v610_v57 = vmul.f32 %v594_v14, %v594_v14 }
 0x1c0   :  { %1638 = vmatprep.subr.bf16.mxu0 %v1924_v0  ;;  %v618_v48 = vadd.f32 %v617_v45, %v603_v44 }
 0x1c2   :  { %v619_v51 = vadd.f32 %v618_v48, %v604_v47  ;;  %v1206_v48 = vld [vmem:[#allocation9 + $0x2] ss:$0 sm:$0xff] }
 0x1c3   :  { %1640 = vmatpush3.bf16.msra.mxu0 %v1639_v62  ;;  %v611_v62 = vmul.f32 %v595_v17, %v595_v17 }
 0x1c4   :  { %1641 = vmatprep.subr.bf16.mxu0 %v1924_v0  ;;  %v620_v54 = vadd.f32 %v619_v51, %v605_v50 }
 0x1c6   :  { %v621_v60 = vadd.f32 %v620_v54, %v606_v53 }
 0x1c7   :  { %1643 = vmatpush3.bf16.msra.mxu0 %v1642_v11  ;;  %v612_v11 = vmul.f32 %v596_v19, %v596_v19 }
 0x1c8   :  { %1644 = vmatprep.subr.bf16.mxu0 %v1924_v0  ;;  %v622_v6 = vadd.f32 %v621_v60, %v607_v56 }
 0x1ca   :  { %v623_v13 = vadd.f32 %v622_v6, %v608_v63  ;;  %v750_v63 = vld [vmem:[#allocation7 + $0x208] sm:$0xff] }
 0x1cb   :  { %1646 = vmatpush3.bf16.msra.mxu0 %v1645_v20 }
 0x1cc   :  { %1647 = vmatprep.subr.bf16.mxu0 %v1924_v0  ;;  %v624_v58 = vadd.f32 %v623_v13, %v609_v10  ;;  %v751_v10 = vld [vmem:[#allocation7 + $0x210] sm:$0xff] }
 0x1cd   :  { %v767_v13 = vmul.f32 %v751_v10, %v751_v10 }
 0x1ce   :  { %v625_v7 = vadd.f32 %v624_v58, %v610_v57  ;;  %v752_v57 = vld [vmem:[#allocation7 + $0x218] sm:$0xff] }
 0x1cf   :  { %1649 = vmatpush3.bf16.msra.mxu0 %v1648_v4  ;;  %v768_v58 = vmul.f32 %v752_v57, %v752_v57 }
 0x1d0   :  { %1674 = vmatprep.subr.bf16.mxu0 %v1924_v0  ;;  %v626_v16 = vadd.f32 %v625_v7, %v611_v62  ;;  %v753_v62 = vld [vmem:[#allocation7 + $0x220] sm:$0xff] }
 0x1d1   :  { %v769_v7 = vmul.f32 %v753_v62, %v753_v62 }
 0x1d2   :  { %v627_v22 = vadd.f32 %v626_v16, %v612_v11  ;;  %v754_v11 = vld [vmem:[#allocation7 + $0x228] sm:$0xff] }
 0x1d3   :  { %v770_v16 = vmul.f32 %v754_v11, %v754_v11 }
 0x1d4   :  { %v628_v20 = vrot.slane %v627_v22, 4 }
 0x1d6   :  { %v629_v2 = vadd.f32 %v628_v20, %v627_v22  ;;  %v755_v20 = vld [vmem:[#allocation7 + $0x230] sm:$0xff] }
 0x1d8   :  { %v630_v3 = vrot.slane %v629_v2, 2 }
 0x1da   :  { %v631_v4 = vadd.f32 %v630_v3, %v629_v2  ;;  %v771_v2 = vmul.f32 %v755_v20, %v755_v20 }
 0x273   :  { %v400_v9 = vpop.f32.mrb[0].mxu1 }
 0x274   :  { %v401_v12 = vadd.f32 %v1204_v5, %v400_v9  ;;  %v1402_v23 = vpop.f32.mrb[1].mxu1  ;;  %v632_v5 = vrot.slane %v631_v4, 1 }
 0x276   :  { %v404_v15 = vsub.f32 0.0, %v401_v12  ;;  %v633_v9 = vadd.f32 %v632_v5, %v631_v4  ;;  %v756_v4 = vld [vmem:[#allocation7 + $0x238] sm:$0xff] }
 0x277   :  { %v772_v5 = vmul.f32 %v756_v4, %v756_v4 }
 0x278   :  { %v405_v18 = vmul.f32 1.442695, %v404_v15  ;;  %v1207_v15 = vld [vmem:[%s2130_s2 + $0x3] sm:$0x1] }
 0x27a   :  { %1768 = vpow2.f32 %v405_v18 }
 0x284   :  { %v1769_v25 = vpop.eup %1768 }
 0x285   :  { %v407_v21 = vadd.f32 1.0, %v1769_v25 }
 0x287   :  { %1770 = vrcp.f32 %v407_v21 }
 0x291   :  { %v1771_v24 = vpop.eup %1770 }
 0x292   :  { %v410_v28 = vmul.f32 %v1771_v24, %v401_v12  ;;  %v634_v12 = vmax.f32 %v633_v9, 1e-30 }
 0x294   :  { %1436 = vmatmul.mubr.f32.vlgmr.msra.gmra.mrb[2].mxu0 %v410_v28  ;;  %1772 = vrsqrt.f32 %v634_v12  ;;  %v757_v12 = vld [vmem:[#allocation7 + $0x240] sm:$0xff] }
 0x295   :  { %1505 = vmatprep.mubr.msk.f32.mxu0 %vm1925_vm0, %v1926_v1 }
 0x29e   :  { %v1773_v23 = vpop.eup %1772 }
 0x29f   :  { %v638_v18 = vmul.f32 %v1773_v23, %v1207_v15  ;;  %v773_v23 = vmul.f32 %v757_v12, %v757_v12 }
 0x2a1   :  { %v643_v25 = vrot.slane %v638_v18, %v2026_v59  ;;  %v758_v18 = vld [vmem:[#allocation7 + $0x248] sm:$0xff] }
 0x2a3   :  { %v645_v21 = vmul.f32 %v643_v25, %v581_v29  ;;  %v646_v24 = vmul.f32 %v643_v25, %v582_v31  ;;  %v647_v32 = vmul.f32 %v643_v25, %v583_v35  ;;  %v648_v34 = vmul.f32 %v643_v25, %v584_v26 }
 0x2a4   :  { %v649_v38 = vmul.f32 %v643_v25, %v585_v30  ;;  %v650_v27 = vmul.f32 %v643_v25, %v586_v36  ;;  %v651_v33 = vmul.f32 %v643_v25, %v587_v42  ;;  %v652_v41 = vmul.f32 %v643_v25, %v588_v46 }
 0x2a5   :  { %v1651_v28 = vpack.c.bf16 %v646_v24, %v645_v21  ;;  %v1654_v37 = vpack.c.bf16 %v648_v34, %v647_v32  ;;  %v653_v31 = vmul.f32 %v643_v25, %v589_v49  ;;  %v654_v39 = vmul.f32 %v643_v25, %v590_v52  ;;  %v759_v24 = vld [vmem:[#allocation7 + $0x250] sm:$0xff]  ;;  %v760_v34 = vld [vmem:[#allocation7 + $0x258] sm:$0xff] }
 0x2a6   :  { %v1657_v40 = vpack.c.bf16 %v650_v27, %v649_v38  ;;  %v1660_v29 = vpack.c.bf16 %v652_v41, %v651_v33  ;;  %v655_v26 = vmul.f32 %v643_v25, %v591_v55  ;;  %v656_v43 = vmul.f32 %v643_v25, %v592_v61  ;;  %v749_v61 = vld [vmem:[#allocation7 + $0x200] sm:$0xff]  ;;  %v762_v41 = vld [vmem:[#allocation7 + $0x268] sm:$0xff] }
 0x2a7   :  { %1652 = vmatpush3.bf16.msra.mxu1 %v1651_v28  ;;  %v1663_v35 = vpack.c.bf16 %v654_v39, %v653_v31  ;;  %v657_v36 = vmul.f32 %v643_v25, %v593_v8  ;;  %v658_v44 = vmul.f32 %v643_v25, %v594_v14  ;;  %v659_v45 = vmul.f32 %v643_v25, %v595_v17  ;;  %v761_v27 = vld [vmem:[#allocation7 + $0x260] sm:$0xff]  ;;  %v763_v39 = vld [vmem:[#allocation7 + $0x270] sm:$0xff] }
 0x2a8   :  { %1653 = vmatprep.subr.bf16.mxu1 %v1924_v0  ;;  %v1666_v30 = vpack.c.bf16 %v656_v43, %v655_v26  ;;  %v660_v46 = vmul.f32 %v643_v25, %v596_v19  ;;  %v765_v6 = vmul.f32 %v749_v61, %v749_v61  ;;  %v766_v8 = vmul.f32 %v750_v63, %v750_v63  ;;  %v764_v43 = vld [vmem:[#allocation7 + $0x278] sm:$0xff] }
 0x2a9   :  { %v1669_v42 = vpack.c.bf16 %v658_v44, %v657_v36  ;;  %v774_v25 = vmul.f32 %v758_v18, %v758_v18  ;;  %v775_v28 = vmul.f32 %v759_v24, %v759_v24 }
 0x2aa   :  { %v1672_v47 = vpack.c.bf16 %v660_v46, %v659_v45  ;;  %v781_v14 = vadd.f32 %v766_v8, %v765_v6 }
 0x2ab   :  { %1655 = vmatpush3.bf16.msra.mxu1 %v1654_v37  ;;  %v776_v37 = vmul.f32 %v760_v34, %v760_v34 }
 0x2ac   :  { %1656 = vmatprep.subr.bf16.mxu1 %v1924_v0  ;;  %v782_v17 = vadd.f32 %v781_v14, %v767_v13 }
 0x2ae   :  { %v783_v19 = vadd.f32 %v782_v17, %v768_v58 }
 0x2af   :  { %1658 = vmatpush3.bf16.msra.mxu1 %v1657_v40  ;;  %v777_v40 = vmul.f32 %v761_v27, %v761_v27 }
 0x2b0   :  { %1659 = vmatprep.subr.bf16.mxu1 %v1924_v0  ;;  %v784_v22 = vadd.f32 %v783_v19, %v769_v7 }
 0x2b2   :  { %v785_v3 = vadd.f32 %v784_v22, %v770_v16 }
 0x2b3   :  { %1661 = vmatpush3.bf16.msra.mxu1 %v1660_v29  ;;  %v778_v29 = vmul.f32 %v762_v41, %v762_v41 }
 0x2b4   :  { %1662 = vmatprep.subr.bf16.mxu1 %v1924_v0  ;;  %v786_v9 = vadd.f32 %v785_v3, %v771_v2 }
 0x2b6   :  { %v787_v15 = vadd.f32 %v786_v9, %v772_v5  ;;  %v1208_v9 = vld [vmem:[#allocation9 + $0x3] ss:$0 sm:$0xff] }
 0x2b7   :  { %1664 = vmatpush3.bf16.msra.mxu1 %v1663_v35  ;;  %v779_v35 = vmul.f32 %v763_v39, %v763_v39 }
 0x2b8   :  { %1665 = vmatprep.subr.bf16.mxu1 %v1924_v0  ;;  %v788_v21 = vadd.f32 %v787_v15, %v773_v23 }
 0x2ba   :  { %v789_v32 = vadd.f32 %v788_v21, %v774_v25 }
 0x2bb   :  { %1667 = vmatpush3.bf16.msra.mxu1 %v1666_v30  ;;  %v780_v30 = vmul.f32 %v764_v43, %v764_v43 }
 0x2bc   :  { %1668 = vmatprep.subr.bf16.mxu1 %v1924_v0  ;;  %v790_v38 = vadd.f32 %v789_v32, %v775_v28 }
 0x2be   :  { %v791_v33 = vadd.f32 %v790_v38, %v776_v37  ;;  %v918_v37 = vld [vmem:[#allocation7 + $0x288] sm:$0xff] }
 0x2bf   :  { %1670 = vmatpush3.bf16.msra.mxu1 %v1669_v42 }
 0x2c0   :  { %1671 = vmatprep.subr.bf16.mxu1 %v1924_v0  ;;  %v792_v31 = vadd.f32 %v791_v33, %v777_v40  ;;  %v919_v40 = vld [vmem:[#allocation7 + $0x290] sm:$0xff] }
 0x2c1   :  { %v935_v33 = vmul.f32 %v919_v40, %v919_v40 }
 0x2c2   :  { %v793_v26 = vadd.f32 %v792_v31, %v778_v29  ;;  %v920_v29 = vld [vmem:[#allocation7 + $0x298] sm:$0xff] }
 0x2c3   :  { %1673 = vmatpush3.bf16.msra.mxu1 %v1672_v47  ;;  %v936_v31 = vmul.f32 %v920_v29, %v920_v29 }
 0x2c4   :  { %1698 = vmatprep.subr.bf16.mxu1 %v1924_v0  ;;  %v794_v36 = vadd.f32 %v793_v26, %v779_v35  ;;  %v921_v35 = vld [vmem:[#allocation7 + $0x2a0] sm:$0xff] }
 0x2c5   :  { %v937_v26 = vmul.f32 %v921_v35, %v921_v35 }
 0x2c6   :  { %v795_v44 = vadd.f32 %v794_v36, %v780_v30  ;;  %v922_v30 = vld [vmem:[#allocation7 + $0x2a8] sm:$0xff] }
 0x2c7   :  { %v938_v36 = vmul.f32 %v922_v30, %v922_v30 }
 0x2c8   :  { %v796_v42 = vrot.slane %v795_v44, 4 }
 0x2ca   :  { %v797_v45 = vadd.f32 %v796_v42, %v795_v44  ;;  %v923_v42 = vld [vmem:[#allocation7 + $0x2b0] sm:$0xff] }
 0x2cc   :  { %v798_v46 = vrot.slane %v797_v45, 2 }
 0x2ce   :  { %v799_v47 = vadd.f32 %v798_v46, %v797_v45  ;;  %v939_v45 = vmul.f32 %v923_v42, %v923_v42 }
 0x367   :  { %v568_v49 = vpop.f32.mrb[2].mxu0 }
 0x368   :  { %v569_v50 = vadd.f32 %v1206_v48, %v568_v49  ;;  %v1437_v51 = vpop.f32.mrb[3].mxu0  ;;  %v800_v48 = vrot.slane %v799_v47, 1 }
 0x36a   :  { %v572_v52 = vsub.f32 0.0, %v569_v50  ;;  %v801_v49 = vadd.f32 %v800_v48, %v799_v47 }
 0x36c   :  { %v573_v53 = vmul.f32 1.442695, %v572_v52  ;;  %v1209_v52 = vld [vmem:[%s2130_s2 + $0x4] sm:$0x1] }
 0x36e   :  { %1774 = vpow2.f32 %v573_v53 }
 0x378   :  { %v1775_v54 = vpop.eup %1774 }
 0x379   :  { %v575_v55 = vadd.f32 1.0, %v1775_v54 }
 0x37b   :  { %1776 = vrcp.f32 %v575_v55 }
 0x385   :  { %v1777_v56 = vpop.eup %1776 }
 0x386   :  { %v578_v60 = vmul.f32 %v1777_v56, %v569_v50  ;;  %v802_v50 = vmax.f32 %v801_v49, 1e-30  ;;  %v925_v49 = vld [vmem:[#allocation7 + $0x2c0] sm:$0xff] }
 0x388   :  { %1471 = vmatmul.mubr.f32.vlgmr.msra.gmra.mrb[2].mxu1 %v578_v60  ;;  %1778 = vrsqrt.f32 %v802_v50  ;;  %v941_v50 = vmul.f32 %v925_v49, %v925_v49 }
 0x389   :  { %1540 = vmatprep.mubr.msk.f32.mxu1 %vm1925_vm0, %v1926_v1 }
 0x392   :  { %v1779_v51 = vpop.eup %1778 }
 0x393   :  { %v806_v53 = vmul.f32 %v1779_v51, %v1209_v52  ;;  %v926_v52 = vld [vmem:[#allocation7 + $0x2c8] sm:$0xff] }
 0x395   :  { %v811_v54 = vrot.slane %v806_v53, %v2026_v59  ;;  %v942_v53 = vmul.f32 %v926_v52, %v926_v52 }
 0x397   :  { %v813_v55 = vmul.f32 %v811_v54, %v749_v61  ;;  %v814_v56 = vmul.f32 %v811_v54, %v750_v63  ;;  %v815_v6 = vmul.f32 %v811_v54, %v751_v10  ;;  %v816_v8 = vmul.f32 %v811_v54, %v752_v57 }
 0x398   :  { %v817_v14 = vmul.f32 %v811_v54, %v753_v62  ;;  %v818_v58 = vmul.f32 %v811_v54, %v754_v11  ;;  %v819_v7 = vmul.f32 %v811_v54, %v755_v20  ;;  %v820_v19 = vmul.f32 %v811_v54, %v756_v4 }
 0x399   :  { %v1675_v60 = vpack.c.bf16 %v814_v56, %v813_v55  ;;  %v1678_v13 = vpack.c.bf16 %v816_v8, %v815_v6  ;;  %v821_v63 = vmul.f32 %v811_v54, %v757_v12  ;;  %v822_v16 = vmul.f32 %v811_v54, %v758_v18  ;;  %v927_v55 = vld [vmem:[#allocation7 + $0x2d0] sm:$0xff]  ;;  %v928_v6 = vld [vmem:[#allocation7 + $0x2d8] sm:$0xff] }
 0x39a   :  { %v1681_v17 = vpack.c.bf16 %v818_v58, %v817_v14  ;;  %v1684_v61 = vpack.c.bf16 %v820_v19, %v819_v7  ;;  %v823_v57 = vmul.f32 %v811_v54, %v759_v24  ;;  %v824_v22 = vmul.f32 %v811_v54, %v760_v34  ;;  %v917_v34 = vld [vmem:[#allocation7 + $0x280] sm:$0xff]  ;;  %v930_v7 = vld [vmem:[#allocation7 + $0x2e8] sm:$0xff] }
 0x39b   :  { %1676 = vmatpush3.bf16.msra.mxu0 %v1675_v60  ;;  %v1687_v10 = vpack.c.bf16 %v822_v16, %v821_v63  ;;  %v825_v11 = vmul.f32 %v811_v54, %v761_v27  ;;  %v826_v2 = vmul.f32 %v811_v54, %v762_v41  ;;  %v827_v3 = vmul.f32 %v811_v54, %v763_v39  ;;  %v929_v14 = vld [vmem:[#allocation7 + $0x2e0] sm:$0xff]  ;;  %v931_v63 = vld [vmem:[#allocation7 + $0x2f0] sm:$0xff] }
 0x39c   :  { %1677 = vmatprep.subr.bf16.mxu0 %v1924_v0  ;;  %v1690_v62 = vpack.c.bf16 %v824_v22, %v823_v57  ;;  %v828_v4 = vmul.f32 %v811_v54, %v764_v43  ;;  %v933_v38 = vmul.f32 %v917_v34, %v917_v34  ;;  %v934_v27 = vmul.f32 %v918_v37, %v918_v37  ;;  %v932_v57 = vld [vmem:[#allocation7 + $0x2f8] sm:$0xff] }
 0x39d   :  { %v1693_v20 = vpack.c.bf16 %v826_v2, %v825_v11  ;;  %v943_v56 = vmul.f32 %v927_v55, %v927_v55  ;;  %v944_v8 = vmul.f32 %v928_v6, %v928_v6  ;;  %v945_v58 = vmul.f32 %v929_v14, %v929_v14 }
 0x39e   :  { %v1696_v5 = vpack.c.bf16 %v828_v4, %v827_v3  ;;  %v949_v41 = vadd.f32 %v934_v27, %v933_v38  ;;  %v946_v19 = vmul.f32 %v930_v7, %v930_v7  ;;  %v947_v16 = vmul.f32 %v931_v63, %v931_v63 }
 0x39f   :  { %1679 = vmatpush3.bf16.msra.mxu0 %v1678_v13  ;;  %v948_v22 = vmul.f32 %v932_v57, %v932_v57 }
 0x3a0   :  { %1680 = vmatprep.subr.bf16.mxu0 %v1924_v0  ;;  %v950_v39 = vadd.f32 %v949_v41, %v935_v33 }
 0x3a2   :  { %v951_v43 = vadd.f32 %v950_v39, %v936_v31 }
 0x3a3   :  { %1682 = vmatpush3.bf16.msra.mxu0 %v1681_v17 }
 0x3a4   :  { %1683 = vmatprep.subr.bf16.mxu0 %v1924_v0  ;;  %v952_v44 = vadd.f32 %v951_v43, %v937_v26 }
 0x3a6   :  { %v953_v46 = vadd.f32 %v952_v44, %v938_v36 }
 0x3a7   :  { %1685 = vmatpush3.bf16.msra.mxu0 %v1684_v61 }
 0x3a8   :  { %1686 = vmatprep.subr.bf16.mxu0 %v1924_v0  ;;  %v954_v48 = vadd.f32 %v953_v46, %v939_v45 }
 0x3ab   :  { %1688 = vmatpush3.bf16.msra.mxu0 %v1687_v10 }
 0x3ac   :  { %1689 = vmatprep.subr.bf16.mxu0 %v1924_v0 }
 0x3af   :  { %1691 = vmatpush3.bf16.msra.mxu0 %v1690_v62 }
 0x3b0   :  { %1692 = vmatprep.subr.bf16.mxu0 %v1924_v0 }
 0x3b3   :  { %1694 = vmatpush3.bf16.msra.mxu0 %v1693_v20 }
 0x3b4   :  { %1695 = vmatprep.subr.bf16.mxu0 %v1924_v0 }
 0x3b7   :  { %1697 = vmatpush3.bf16.msra.mxu0 %v1696_v5 }
 0x3b8   :  { %1722 = vmatprep.subr.bf16.mxu0 %v1924_v0 }
 0x45b   :  { %v736_v12 = vpop.f32.mrb[2].mxu1 }
 0x45c   :  { %v737_v23 = vadd.f32 %v1208_v9, %v736_v12  ;;  %v1472_v15 = vpop.f32.mrb[3].mxu1 }
 0x45d   :  { %v1211_v15 = vld [vmem:[%s2130_s2 + $0x5] sm:$0x1] }
 0x45e   :  { %v740_v18 = vsub.f32 0.0, %v737_v23 }
 0x460   :  { %v741_v25 = vmul.f32 1.442695, %v740_v18 }
 0x462   :  { %1780 = vpow2.f32 %v741_v25 }
 0x46c   :  { %v1781_v21 = vpop.eup %1780 }
 0x46d   :  { %v743_v24 = vadd.f32 1.0, %v1781_v21 }
 0x46f   :  { %1782 = vrcp.f32 %v743_v24 }
 0x479   :  { %v1783_v28 = vpop.eup %1782 }
 0x47a   :  { %v746_v32 = vmul.f32 %v1783_v28, %v737_v23 }
 0x47c   :  { %1506 = vmatmul.mubr.f32.vlgmr.msra.gmra.mrb[4].mxu0 %v746_v32 }
 0x47d   :  { %1575 = vmatprep.mubr.msk.f32.mxu0 %vm1925_vm0, %v1926_v1  ;;  %v924_v1 = vld [vmem:[#allocation7 + $0x2b8] sm:$0xff] }
 0x47e   :  { %v940_v47 = vmul.f32 %v924_v1, %v924_v1 }
 0x480   :  { %v955_v51 = vadd.f32 %v954_v48, %v940_v47 }
 0x482   :  { %v956_v54 = vadd.f32 %v955_v51, %v941_v50 }
 0x484   :  { %v957_v60 = vadd.f32 %v956_v54, %v942_v53 }
 0x486   :  { %v958_v13 = vadd.f32 %v957_v60, %v943_v56  ;;  %v1085_v56 = vld [vmem:[#allocation10] sm:$0xff]  ;;  %v1086_v60 = vld [vmem:[#allocation10 + $0x8] sm:$0xff] }
 0x488   :  { %v959_v17 = vadd.f32 %v958_v13, %v944_v8  ;;  %v1087_v8 = vld [vmem:[#allocation10 + $0x10] sm:$0xff]  ;;  %v1088_v13 = vld [vmem:[#allocation10 + $0x18] sm:$0xff] }
 0x48a   :  { %v960_v61 = vadd.f32 %v959_v17, %v945_v58  ;;  %v1089_v58 = vld [vmem:[#allocation10 + $0x20] sm:$0xff]  ;;  %v1090_v17 = vld [vmem:[#allocation10 + $0x28] sm:$0xff] }
 0x48c   :  { %v961_v10 = vadd.f32 %v960_v61, %v946_v19  ;;  %v1091_v19 = vld [vmem:[#allocation10 + $0x30] sm:$0xff]  ;;  %v1092_v61 = vld [vmem:[#allocation10 + $0x38] sm:$0xff] }
 0x48e   :  { %v962_v62 = vadd.f32 %v961_v10, %v947_v16  ;;  %v1093_v16 = vld [vmem:[#allocation10 + $0x40] sm:$0xff]  ;;  %v1094_v10 = vld [vmem:[#allocation10 + $0x48] sm:$0xff] }
 0x490   :  { %v963_v11 = vadd.f32 %v962_v62, %v948_v22  ;;  %v1095_v22 = vld [vmem:[#allocation10 + $0x50] sm:$0xff]  ;;  %v1096_v62 = vld [vmem:[#allocation10 + $0x58] sm:$0xff] }
 0x492   :  { %v964_v2 = vrot.slane %v963_v11, 4 }
 0x494   :  { %v965_v20 = vadd.f32 %v964_v2, %v963_v11  ;;  %v1738_v11 = vpack.c.bf16 %v1096_v62, %v1095_v22  ;;  %v1097_v2 = vld [vmem:[#allocation10 + $0x60] sm:$0xff] }
 0x496   :  { %v966_v3 = vrot.slane %v965_v20, 2 }
 0x498   :  { %v967_v4 = vadd.f32 %v966_v3, %v965_v20  ;;  %v1098_v20 = vld [vmem:[#allocation10 + $0x68] sm:$0xff] }
 0x499   :  { %v1741_v3 = vpack.c.bf16 %v1098_v20, %v1097_v2 }
 0x49a   :  { %v968_v5 = vrot.slane %v967_v4, 1 }
 0x49c   :  { %v969_v9 = vadd.f32 %v968_v5, %v967_v4  ;;  %v1099_v4 = vld [vmem:[#allocation10 + $0x70] sm:$0xff]  ;;  %v1100_v5 = vld [vmem:[#allocation10 + $0x78] sm:$0xff] }
 0x49e   :  { %v970_v12 = vmax.f32 %v969_v9, 1e-30  ;;  %v1744_v9 = vpack.c.bf16 %v1100_v5, %v1099_v4 }
 0x4a0   :  { %1784 = vrsqrt.f32 %v970_v12  ;;  %v1212_v12 = vld [vmem:[#allocation9 + $0x5] ss:$0 sm:$0xff] }
 0x4aa   :  { %v1785_v23 = vpop.eup %1784 }
 0x4ab   :  { %v974_v18 = vmul.f32 %v1785_v23, %v1211_v15 }
 0x4ad   :  { %v979_v25 = vrot.slane %v974_v18, %v2026_v59 }
 0x4af   :  { %v981_v21 = vmul.f32 %v979_v25, %v917_v34  ;;  %v982_v24 = vmul.f32 %v979_v25, %v918_v37  ;;  %v983_v32 = vmul.f32 %v979_v25, %v919_v40  ;;  %v984_v38 = vmul.f32 %v979_v25, %v920_v29 }
 0x4b0   :  { %v985_v33 = vmul.f32 %v979_v25, %v921_v35  ;;  %v986_v41 = vmul.f32 %v979_v25, %v922_v30  ;;  %v987_v39 = vmul.f32 %v979_v25, %v923_v42  ;;  %v988_v26 = vmul.f32 %v979_v25, %v924_v1  ;;  %v1210_v1 = vld [vmem:[#allocation9 + $0x4] ss:$0 sm:$0xff] }
 0x4b1   :  { %v1699_v28 = vpack.c.bf16 %v982_v24, %v981_v21  ;;  %v1702_v27 = vpack.c.bf16 %v984_v38, %v983_v32  ;;  %v989_v34 = vmul.f32 %v979_v25, %v925_v49  ;;  %v990_v37 = vmul.f32 %v979_v25, %v926_v52 }
 0x4b2   :  { %v1705_v31 = vpack.c.bf16 %v986_v41, %v985_v33  ;;  %v1708_v59 = vpack.c.bf16 %v988_v26, %v987_v39  ;;  %v991_v29 = vmul.f32 %v979_v25, %v927_v55  ;;  %v992_v43 = vmul.f32 %v979_v25, %v928_v6 }
 0x4b3   :  { %1700 = vmatpush3.bf16.msra.mxu1 %v1699_v28  ;;  %v1711_v40 = vpack.c.bf16 %v990_v37, %v989_v34  ;;  %v993_v30 = vmul.f32 %v979_v25, %v929_v14  ;;  %v994_v36 = vmul.f32 %v979_v25, %v930_v7  ;;  %v995_v42 = vmul.f32 %v979_v25, %v931_v63 }
 0x4b4   :  { %1701 = vmatprep.subr.bf16.mxu1 %v1924_v0  ;;  %v1714_v35 = vpack.c.bf16 %v992_v43, %v991_v29  ;;  %v996_v45 = vmul.f32 %v979_v25, %v932_v57  ;;  %v1723_v6 = vpack.c.bf16 %v1086_v60, %v1085_v56  ;;  %v1726_v14 = vpack.c.bf16 %v1088_v13, %v1087_v8 }
 0x4b5   :  { %v1717_v44 = vpack.c.bf16 %v994_v36, %v993_v30  ;;  %v1729_v7 = vpack.c.bf16 %v1090_v17, %v1089_v58  ;;  %v1732_v63 = vpack.c.bf16 %v1092_v61, %v1091_v19  ;;  %v1735_v57 = vpack.c.bf16 %v1094_v10, %v1093_v16 }
 0x4b6   :  { %v1720_v46 = vpack.c.bf16 %v996_v45, %v995_v42  ;;  %1724 = vmatpush3.bf16.msra.mxu0 %v1723_v6 }
 0x4b7   :  { %1703 = vmatpush3.bf16.msra.mxu1 %v1702_v27  ;;  %1725 = vmatprep.subr.bf16.mxu0 %v1924_v0 }
 0x4b8   :  { %1704 = vmatprep.subr.bf16.mxu1 %v1924_v0 }
 0x4ba   :  { %1727 = vmatpush3.bf16.msra.mxu0 %v1726_v14 }
 0x4bb   :  { %1706 = vmatpush3.bf16.msra.mxu1 %v1705_v31  ;;  %1728 = vmatprep.subr.bf16.mxu0 %v1924_v0 }
 0x4bc   :  { %1707 = vmatprep.subr.bf16.mxu1 %v1924_v0 }
 0x4be   :  { %1730 = vmatpush3.bf16.msra.mxu0 %v1729_v7 }
 0x4bf   :  { %1709 = vmatpush3.bf16.msra.mxu1 %v1708_v59  ;;  %1731 = vmatprep.subr.bf16.mxu0 %v1924_v0 }
 0x4c0   :  { %1710 = vmatprep.subr.bf16.mxu1 %v1924_v0 }
 0x4c2   :  { %1733 = vmatpush3.bf16.msra.mxu0 %v1732_v63 }
 0x4c3   :  { %1712 = vmatpush3.bf16.msra.mxu1 %v1711_v40  ;;  %1734 = vmatprep.subr.bf16.mxu0 %v1924_v0 }
 0x4c4   :  { %1713 = vmatprep.subr.bf16.mxu1 %v1924_v0 }
 0x4c6   :  { %1736 = vmatpush3.bf16.msra.mxu0 %v1735_v57 }
 0x4c7   :  { %1715 = vmatpush3.bf16.msra.mxu1 %v1714_v35  ;;  %1737 = vmatprep.subr.bf16.mxu0 %v1924_v0 }
 0x4c8   :  { %1716 = vmatprep.subr.bf16.mxu1 %v1924_v0 }
 0x4ca   :  { %1739 = vmatpush3.bf16.msra.mxu0 %v1738_v11 }
 0x4cb   :  { %1718 = vmatpush3.bf16.msra.mxu1 %v1717_v44  ;;  %1740 = vmatprep.subr.bf16.mxu0 %v1924_v0 }
 0x4cc   :  { %1719 = vmatprep.subr.bf16.mxu1 %v1924_v0 }
 0x4ce   :  { %1742 = vmatpush3.bf16.msra.mxu0 %v1741_v3 }
 0x4cf   :  { %1721 = vmatpush3.bf16.msra.mxu1 %v1720_v46  ;;  %1743 = vmatprep.subr.bf16.mxu0 %v1924_v0  ;;  %v1213_v0 = vld [vmem:[%s2133_s5] ss:$0 sm:$0xff] }
 0x4d2   :  { %1745 = vmatpush3.bf16.msra.mxu0 %v1744_v9 }
 0x54f   :  { %v904_v47 = vpop.f32.mrb[4].mxu0 }
 0x550   :  { %v905_v48 = vadd.f32 %v1210_v1, %v904_v47  ;;  %v1507_v49 = vpop.f32.mrb[5].mxu0 }
 0x552   :  { %v908_v50 = vsub.f32 0.0, %v905_v48 }
 0x554   :  { %v909_v51 = vmul.f32 1.442695, %v908_v50 }
 0x556   :  { %1786 = vpow2.f32 %v909_v51 }
 0x560   :  { %v1787_v52 = vpop.eup %1786 }
 0x561   :  { %v911_v53 = vadd.f32 1.0, %v1787_v52 }
 0x563   :  { %1788 = vrcp.f32 %v911_v53 }
 0x56d   :  { %v1789_v54 = vpop.eup %1788 }
 0x56e   :  { %v914_v55 = vmul.f32 %v1789_v54, %v905_v48 }
 0x570   :  { %1541 = vmatmul.mubr.f32.vlgmr.msra.gmra.mrb[4].mxu1 %v914_v55 }
 0x643   :  { %v1072_v23 = vpop.f32.mrb[4].mxu1 }
 0x644   :  { %v1073_v15 = vadd.f32 %v1212_v12, %v1072_v23  ;;  %v1542_v18 = vpop.f32.mrb[5].mxu1 }
 0x646   :  { %v1076_v25 = vsub.f32 0.0, %v1073_v15 }
 0x648   :  { %v1077_v21 = vmul.f32 1.442695, %v1076_v25 }
 0x64a   :  { %1790 = vpow2.f32 %v1077_v21 }
 0x654   :  { %v1791_v24 = vpop.eup %1790 }
 0x655   :  { %v1079_v28 = vadd.f32 1.0, %v1791_v24 }
 0x657   :  { %1792 = vrcp.f32 %v1079_v28 }
 0x661   :  { %v1793_v32 = vpop.eup %1792 }
 0x662   :  { %v1082_v38 = vmul.f32 %v1793_v32, %v1073_v15 }
 0x664   :  { %1576 = vmatmul.mubr.f32.vlgmr.msra.gmra.mrb[6].mxu0 %v1082_v38 }
 0x737   :  { %v1174_v27 = vpop.f32.mrb[6].mxu0 }
 0x738   :  { %v1175_v33 = vadd.f32 %v1213_v0, %v1174_v27  ;;  %v1577_v41 = vpop.f32.mrb[7].mxu0 }
 0x73a   :  { %v1178_v31 = vsub.f32 0.0, %v1175_v33 }
 0x73c   :  { %v1179_v39 = vmul.f32 1.442695, %v1178_v31 }
 0x73e   :  { %1794 = vpow2.f32 %v1179_v39 }
 0x748   :  { %v1795_v26 = vpop.eup %1794 }
 0x749   :  { %v1181_v59 = vadd.f32 1.0, %v1795_v26 }
 0x74b   :  { %1796 = vrcp.f32 %v1181_v59 }
 0x755   :  { %v1797_v34 = vpop.eup %1796 }
 0x756   :  { %1184 = vst [vmem:[#allocation12] sm:$0xff] %v1797_v34 }
 0x757   :  { %1897 = shalt.err (!%p1894_p8)
}
 0x758   :  { %s1898_s15 = scalar_lea.hbm %s2134_s6, 128 }
 0x759   :  { %p1899_p9 = scmp.ne.s32.totalorder %s2134_s6, %s1898_s15  ;;  %p1902_p10 = scmp.lt.u32.totalorder %s1898_s15, %s2134_s6 }
 0x75b   :  { %p1904_p11 = pnand %p1902_p10, %p1899_p9 }
 0x75d   :  { %1907 = shalt.err (!%p1904_p11)
}
 0x75e   :  { %1194 = dma.vmem_to_hbm [thread:$0]  %s1192_s11, 128, %s2134_s6, [#allocation6]  }
 0x75f   :  { %1914 = dma.done.wait [#allocation6], 128  }
 0x760   :  { %1915 = vsyncadd [#allocation6], 4294967168 }
 0x761   :  { %1198 = vsyncpa [#allocation5], 1 }
 0x762   :  { %1199 = vsyncpa [#allocation8], 1 }
 0x763   :  { %1200 = vsyncpa [#allocation11], 1 }
 0x764   :  { %1201 = vsyncpa [#allocation6], 1 }

</bundles_post_ra>
